<compile_context>
chip_gen: v6e
topology: v6e:2x2x1
jax: 0.10.0
libtpu: 0.0.40
codegen_flags: <defaults>
</compile_context>

<pallas_src>
import functools

import jax
import jax.numpy as jnp
from jax import lax
from jax.experimental import pallas as pl
from jax.experimental.pallas import tpu as pltpu

f32 = jnp.float32
bf16 = jnp.bfloat16


def _ceil_to(x, m):
    return x + (-x) % m


def _act(x, kind):
    if kind == "relu":
        return jnp.maximum(x, 0.0)
    if kind == "relu6":
        return jnp.clip(x, 0.0, 6.0)
    return x


# --------------------------------------------------------------------------- #
# Matmul kernel (1x1 convs, MLPs) -- bf16 MXU operands, fused bias/act/pre-BN
# --------------------------------------------------------------------------- #
def _mm_kernel(*refs, act, has_bias, has_pre, pre_act):
    idx = 0
    a_ref = refs[idx]; idx += 1
    b_ref = refs[idx]; idx += 1
    if has_pre:
        s_ref = refs[idx]; t_ref = refs[idx + 1]; idx += 2
    if has_bias:
        bias_ref = refs[idx]; idx += 1
    o_ref = refs[idx]

    a = a_ref[...]
    if has_pre:                                   # fused BN-apply of the producer
        a = _act(a * s_ref[...] + t_ref[...], pre_act)
    r = jnp.dot(a.astype(bf16), b_ref[...].astype(bf16),
                preferred_element_type=f32)
    if has_bias:
        r = r + bias_ref[...]
    o_ref[...] = _act(r, act)


@functools.partial(jax.jit, static_argnames=("act", "pre_act"))
def _mm_jit(a, w, bias, pre_scale, pre_shift, *, act, pre_act):
    M, K = a.shape
    N = w.shape[1]
    has_bias = bias is not None
    has_pre = pre_scale is not None
    if M <= 512:
        bm, Mp = M, M
    else:
        bm, Mp = 256, _ceil_to(M, 256)
    if N <= 512:
        bn, Np = N, N
    else:
        bn, Np = 256, _ceil_to(N, 256)
    ap = a if Mp == M else jnp.pad(a, ((0, Mp - M), (0, 0)))
    wp = w if Np == N else jnp.pad(w, ((0, 0), (0, Np - N)))
    arrays = [ap, wp]
    in_specs = [pl.BlockSpec((bm, K), lambda i, j: (i, 0)),
                pl.BlockSpec((K, bn), lambda i, j: (0, j))]
    if has_pre:
        arrays += [pre_scale.reshape(1, K).astype(f32),
                   pre_shift.reshape(1, K).astype(f32)]
        in_specs += [pl.BlockSpec((1, K), lambda i, j: (0, 0)),
                     pl.BlockSpec((1, K), lambda i, j: (0, 0))]
    if has_bias:
        bp = bias.reshape(1, N).astype(f32)
        if Np != N:
            bp = jnp.pad(bp, ((0, 0), (0, Np - N)))
        arrays.append(bp)
        in_specs.append(pl.BlockSpec((1, bn), lambda i, j: (0, j)))
    out = pl.pallas_call(
        functools.partial(_mm_kernel, act=act, has_bias=has_bias,
                          has_pre=has_pre, pre_act=pre_act),
        out_shape=jax.ShapeDtypeStruct((Mp, Np), f32),
        grid=(Mp // bm, Np // bn),
        in_specs=in_specs,
        out_specs=pl.BlockSpec((bm, bn), lambda i, j: (i, j)),
        compiler_params=pltpu.CompilerParams(
            dimension_semantics=("parallel", "parallel")),
    )(*arrays)
    if Mp != M or Np != N:
        out = out[:M, :N]
    return out


def pallas_matmul(a, w, bias=None, act="none", pre=None):
    ps, pt, pa = (None, None, "none") if pre is None else pre
    return _mm_jit(a, w, bias, ps, pt, act=act, pre_act=pa)


# --------------------------------------------------------------------------- #
# Direct (grouped) convolution -- no im2col in HBM, per-tap bf16 MXU matmuls,
# optional fused BN-apply ("pre") of the producing layer.
# Grid is (weight-replica, group, batch); per-(branch,group) weights are selected
# with an affine index map so all 8 groups x 3 multi-scale chains run in ONE call.
# --------------------------------------------------------------------------- #
def _conv_kernel(*refs, kh, kw, Ho, Wo, act, has_bias, has_pre, pre_act, has_mask):
    idx = 0
    x_ref = refs[idx]; idx += 1
    w_ref = refs[idx]; idx += 1
    if has_pre:
        s_ref = refs[idx]; t_ref = refs[idx + 1]; idx += 2
        if has_mask:
            m_ref = refs[idx]; idx += 1
    if has_bias:
        b_ref = refs[idx]; idx += 1
    o_ref = refs[idx]

    xv = x_ref[0, 0]                                     # (Hp, Wp, Cin) f32
    if has_pre:
        # fused BatchNorm apply + activation of the previous layer (in VMEM)
        xv = _act(xv * s_ref[...] + t_ref[...], pre_act)
        if has_mask:                                     # re-zero the conv halo
            xv = xv * m_ref[...]
    xb = xv.astype(bf16)
    wb = w_ref[0].astype(bf16)                           # (KK, Cin, Cout)
    cin = xb.shape[-1]
    # hoist the width(-sublane) shifted views out of the tap loop
    cols = [xb[:, j:j + Wo, :] for j in range(kw)]
    acc = None
    for di in range(kh):
        for dj in range(kw):
            win = cols[dj][di:di + Ho]                   # (Ho, Wo, Cin)
            p = jnp.dot(win.reshape(Ho * Wo, cin), wb[di * kw + dj],
                        preferred_element_type=f32)      # one 2-D MXU matmul / tap
            acc = p if acc is None else acc + p
    if has_bias:
        acc = acc + b_ref[0]
    acc = _act(acc, act)
    o_ref[0, 0] = acc.reshape(Ho, Wo, -1)


@functools.partial(jax.jit, static_argnames=("pad", "act", "pre_act"))
def _conv_g_jit(x, w, bias, pre_scale, pre_shift, *, pad, act, pre_act):
    Gx, N, H, W, Cin = x.shape
    Gw, kh, kw, _, Cout = w.shape
    assert Gw % Gx == 0
    R = Gw // Gx
    Hp, Wp = H + 2 * pad, W + 2 * pad
    Ho, Wo = Hp - kh + 1, Wp - kw + 1
    has_bias = bias is not None
    has_pre = pre_scale is not None
    has_mask = has_pre and pad > 0
    xp = jnp.pad(x, ((0, 0), (0, 0), (pad, pad), (pad, pad), (0, 0))) if pad else x
    wr = w.reshape(Gw, kh * kw, Cin, Cout).astype(f32)

    arrays = [xp, wr]
    in_specs = [pl.BlockSpec((1, 1, Hp, Wp, Cin), lambda b, g, n: (g, n, 0, 0, 0)),
                pl.BlockSpec((1, kh * kw, Cin, Cout),
                             lambda b, g, n: (b * Gx + g, 0, 0, 0))]
    if has_pre:
        arrays += [pre_scale.reshape(Gx, 1, Cin).astype(f32),
                   pre_shift.reshape(Gx, 1, Cin).astype(f32)]
        in_specs += [pl.BlockSpec((1, 1, Cin), lambda b, g, n: (g, 0, 0)),
                     pl.BlockSpec((1, 1, Cin), lambda b, g, n: (g, 0, 0))]
        if has_mask:
            mask = jnp.pad(jnp.ones((H, W, 1), f32),
                           ((pad, pad), (pad, pad), (0, 0)))
            arrays.append(mask)
            in_specs.append(pl.BlockSpec((Hp, Wp, 1), lambda b, g, n: (0, 0, 0)))
    if has_bias:
        arrays.append(bias.reshape(Gw, 1, Cout).astype(f32))
        in_specs.append(pl.BlockSpec((1, 1, Cout), lambda b, g, n: (b * Gx + g, 0, 0)))

    return pl.pallas_call(
        functools.partial(_conv_kernel, kh=kh, kw=kw, Ho=Ho, Wo=Wo, act=act,
                          has_bias=has_bias, has_pre=has_pre, pre_act=pre_act,
                          has_mask=has_mask),
        out_shape=jax.ShapeDtypeStruct((Gw, N, Ho, Wo, Cout), f32),
        grid=(R, Gx, N),
        in_specs=in_specs,
        out_specs=pl.BlockSpec((1, 1, Ho, Wo, Cout),
                               lambda b, g, n: (b * Gx + g, n, 0, 0, 0)),
        compiler_params=pltpu.CompilerParams(
            dimension_semantics=("parallel", "parallel", "parallel")),
    )(*arrays)


def conv2d_g(x, w, bias=None, pad=None, act="none", pre=None):
    if pad is None:
        pad = (w.shape[1] - 1) // 2
    ps, pt, pa = (None, None, "none") if pre is None else pre
    return _conv_g_jit(x, w, bias, ps, pt, pad=int(pad), act=act, pre_act=pa)


def conv2d(x, w, bias=None, pad=None, act="none", pre=None, stride=1):
    if pad is None:
        pad = (w.shape[0] - 1) // 2
    ps, pt, pa = (None, None, "none") if pre is None else pre
    y = _conv_g_jit(x[None], w[None],
                    None if bias is None else bias[None],
                    None if ps is None else ps[None],
                    None if pt is None else pt[None],
                    pad=int(pad), act=act, pre_act=pa)[0]
    if stride != 1:
        # TODO(synk): add a true strided / row-tiled direct-conv path; stride-1 +
        # subsample is correct but does stride^2 extra work (only the tiny encoder
        # stub uses it at these shapes).
        y = y[:, ::stride, ::stride, :]
    return y


# --------------------------------------------------------------------------- #
# Depthwise convolution (VPU FMA tap loop, f32 elementwise math -> v5e safe)
# --------------------------------------------------------------------------- #
def _dw_kernel(*refs, kh, kw, Ho, Wo, act, has_bias, has_pre, pre_act, has_mask):
    idx = 0
    x_ref = refs[idx]; idx += 1
    w_ref = refs[idx]; idx += 1
    if has_pre:
        s_ref = refs[idx]; t_ref = refs[idx + 1]; idx += 2
        if has_mask:
            m_ref = refs[idx]; idx += 1
    if has_bias:
        b_ref = refs[idx]; idx += 1
    o_ref = refs[idx]

    xv = x_ref[0, 0]                                     # (Hp, Wp, C)
    if has_pre:
        xv = _act(xv * s_ref[...] + t_ref[...], pre_act)
        if has_mask:
            xv = xv * m_ref[...]
    wv = w_ref[0]                                        # (KK, C)
    cols = [xv[:, j:j + Wo, :] for j in range(kw)]       # hoisted sublane shifts
    acc = None
    for di in range(kh):
        for dj in range(kw):
            t = di * kw + dj
            part = cols[dj][di:di + Ho] * wv[t:t + 1][None]   # (Ho,Wo,C)*(1,1,C)
            acc = part if acc is None else acc + part
    if has_bias:
        acc = acc + b_ref[...]
    o_ref[0, 0] = _act(acc, act)


@functools.partial(jax.jit, static_argnames=("pad", "act", "pre_act"))
def _dw_g_jit(x, w, bias, pre_scale, pre_shift, *, pad, act, pre_act):
    Gx, N, H, W, C = x.shape
    Gw, kh, kw, _ = w.shape
    assert Gw % Gx == 0
    R = Gw // Gx
    Hp, Wp = H + 2 * pad, W + 2 * pad
    Ho, Wo = Hp - kh + 1, Wp - kw + 1
    has_bias = bias is not None
    has_pre = pre_scale is not None
    has_mask = has_pre and pad > 0
    xp = jnp.pad(x, ((0, 0), (0, 0), (pad, pad), (pad, pad), (0, 0))) if pad else x
    wr = w.reshape(Gw, kh * kw, C).astype(f32)

    arrays = [xp, wr]
    in_specs = [pl.BlockSpec((1, 1, Hp, Wp, C), lambda b, g, n: (g, n, 0, 0, 0)),
                pl.BlockSpec((1, kh * kw, C), lambda b, g, n: (b * Gx + g, 0, 0))]
    if has_pre:
        arrays += [pre_scale.reshape(Gx, 1, C).astype(f32),
                   pre_shift.reshape(Gx, 1, C).astype(f32)]
        in_specs += [pl.BlockSpec((1, 1, C), lambda b, g, n: (g, 0, 0)),
                     pl.BlockSpec((1, 1, C), lambda b, g, n: (g, 0, 0))]
        if has_mask:
            mask = jnp.pad(jnp.ones((H, W, 1), f32),
                           ((pad, pad), (pad, pad), (0, 0)))
            arrays.append(mask)
            in_specs.append(pl.BlockSpec((Hp, Wp, 1), lambda b, g, n: (0, 0, 0)))
    if has_bias:
        arrays.append(bias.reshape(Gw, 1, C).astype(f32))
        in_specs.append(pl.BlockSpec((1, 1, C), lambda b, g, n: (b * Gx + g, 0, 0)))

    return pl.pallas_call(
        functools.partial(_dw_kernel, kh=kh, kw=kw, Ho=Ho, Wo=Wo, act=act,
                          has_bias=has_bias, has_pre=has_pre, pre_act=pre_act,
                          has_mask=has_mask),
        out_shape=jax.ShapeDtypeStruct((Gw, N, Ho, Wo, C), f32),
        grid=(R, Gx, N),
        in_specs=in_specs,
        out_specs=pl.BlockSpec((1, 1, Ho, Wo, C),
                               lambda b, g, n: (b * Gx + g, n, 0, 0, 0)),
        compiler_params=pltpu.CompilerParams(
            dimension_semantics=("parallel", "parallel", "parallel")),
    )(*arrays)


def dwconv2d_g(x, w, bias=None, pad=None, act="none", pre=None):
    if pad is None:
        pad = (w.shape[1] - 1) // 2
    ps, pt, pa = (None, None, "none") if pre is None else pre
    return _dw_g_jit(x, w, bias, ps, pt, pad=int(pad), act=act, pre_act=pa)


def dwconv2d(x, w, bias=None, pad=None, act="none", pre=None):
    if pad is None:
        pad = (w.shape[0] - 1) // 2
    ps, pt, pa = (None, None, "none") if pre is None else pre
    return _dw_g_jit(x[None], w[None],
                     None if bias is None else bias[None],
                     None if ps is None else ps[None],
                     None if pt is None else pt[None],
                     pad=int(pad), act=act, pre_act=pa)[0]


# --------------------------------------------------------------------------- #
# Fused affine (BN apply) + residual + activation; attention gating multiply
# --------------------------------------------------------------------------- #
def _affine_kernel(*refs, act, has_res):
    if has_res:
        x_ref, s_ref, t_ref, r_ref, o_ref = refs
    else:
        x_ref, s_ref, t_ref, o_ref = refs
    r = x_ref[...] * s_ref[...] + t_ref[...]
    if has_res:
        r = r + r_ref[...]
    o_ref[...] = _act(r, act)


@functools.partial(jax.jit, static_argnames=("act",))
def _affine_jit(x2, scale, shift, residual, *, act):
    R, C = x2.shape
    bR = R if R <= 1024 else 512
    Rp = _ceil_to(R, bR)
    xp = x2 if Rp == R else jnp.pad(x2, ((0, Rp - R), (0, 0)))
    has_res = residual is not None
    arrays = [xp, scale.reshape(1, C).astype(f32), shift.reshape(1, C).astype(f32)]
    in_specs = [pl.BlockSpec((bR, C), lambda i: (i, 0)),
                pl.BlockSpec((1, C), lambda i: (0, 0)),
                pl.BlockSpec((1, C), lambda i: (0, 0))]
    if has_res:
        rp = residual if Rp == R else jnp.pad(residual, ((0, Rp - R), (0, 0)))
        arrays.append(rp)
        in_specs.append(pl.BlockSpec((bR, C), lambda i: (i, 0)))
    out = pl.pallas_call(
        functools.partial(_affine_kernel, act=act, has_res=has_res),
        out_shape=jax.ShapeDtypeStruct((Rp, C), f32),
        grid=(Rp // bR,),
        in_specs=in_specs,
        out_specs=pl.BlockSpec((bR, C), lambda i: (i, 0)),
        compiler_params=pltpu.CompilerParams(dimension_semantics=("parallel",)),
    )(*arrays)
    return out[:R] if Rp != R else out


def scale_shift_act(x, scale, shift, residual=None, act="none"):
    shp = x.shape
    C = shp[-1]
    r2 = None if residual is None else residual.reshape(-1, C)
    return _affine_jit(x.reshape(-1, C), scale, shift, r2, act=act).reshape(shp)


def _gate_kernel(x_ref, a_ref, o_ref):
    o_ref[...] = x_ref[...] * a_ref[...]


@jax.jit
def _gmul_jit(x3, a3):
    N, R, C = x3.shape
    Ra, Ca = a3.shape[1], a3.shape[2]
    return pl.pallas_call(
        _gate_kernel,
        out_shape=jax.ShapeDtypeStruct((N, R, C), f32),
        grid=(N,),
        in_specs=[pl.BlockSpec((1, R, C), lambda n: (n, 0, 0)),
                  pl.BlockSpec((1, Ra, Ca), lambda n: (n, 0, 0))],
        out_specs=pl.BlockSpec((1, R, C), lambda n: (n, 0, 0)),
        compiler_params=pltpu.CompilerParams(dimension_semantics=("parallel",)),
    )(x3, a3)


def gmul(x, att):
    """x * attention; (N,1,1,C) / (N,H,W,1) gates broadcast inside the kernel."""
    N, H, W, C = x.shape
    att = att.astype(f32)
    R = H * W
    x3 = x.reshape(N, R, C)
    if att.shape == (N, 1, 1, C):
        a3 = att.reshape(N, 1, C)
    elif att.shape == (N, H, W, 1):
        a3 = att.reshape(N, R, 1)
    else:
        a3 = jnp.broadcast_to(att, x.shape).reshape(N, R, C)
    # TODO(synk): tile the row axis for very large H*W; whole-image blocks fit here.
    return _gmul_jit(x3, a3).reshape(N, H, W, C)


# --------------------------------------------------------------------------- #
# Multi-head channel attention (all heads in one grid step, softmax in-kernel)
# --------------------------------------------------------------------------- #
def _attn_kernel(q_ref, k_ref, v_ref, o_ref, *, heads):
    for h in range(heads):
        qh = q_ref[0, h].astype(bf16)                    # (ch, HW)
        kh_ = k_ref[0, h].astype(bf16)
        vh = v_ref[0, h].astype(bf16)
        att = lax.dot_general(qh, kh_, (((1,), (1,)), ((), ())),
                              preferred_element_type=f32)          # (ch, ch)
        att = att - jnp.max(att, axis=-1, keepdims=True)
        e = jnp.exp(att)
        att = e * pl.reciprocal(jnp.sum(e, axis=-1, keepdims=True), approx=True)
        o_ref[0, h] = jnp.dot(att.astype(bf16), vh, preferred_element_type=f32)


@jax.jit
def _attn_jit(q, k, v):
    N, heads, ch, HW = q.shape
    spec = pl.BlockSpec((1, heads, ch, HW), lambda n: (n, 0, 0, 0))
    return pl.pallas_call(
        functools.partial(_attn_kernel, heads=heads),
        out_shape=jax.ShapeDtypeStruct((N, heads, ch, HW), f32),
        grid=(N,),
        in_specs=[spec, spec, spec],
        out_specs=spec,
        compiler_params=pltpu.CompilerParams(dimension_semantics=("parallel",)),
    )(q, k, v)


# --------------------------------------------------------------------------- #
# BatchNorm statistics (XLA reduce) -- apply is fused into the consumer kernel.
# TODO(synk): emit per-block partial sums from the conv kernels to avoid this read.
# --------------------------------------------------------------------------- #
@jax.jit
def bn_scale_shift(y, gamma, beta):
    eps = 1e-5
    axes = (1, 2, 3) if y.ndim == 5 else tuple(range(y.ndim - 1))
    n = 1
    for a in axes:
        n *= y.shape[a]
    s1 = jnp.sum(y, axis=axes)
    s2 = jnp.sum(y * y, axis=axes)
    mean = s1 / n
    var = jnp.maximum(s2 / n - mean * mean, 0.0)
    scale = gamma * lax.rsqrt(var + eps)
    shift = beta - mean * scale
    return scale, shift


@functools.partial(jax.jit, static_argnames=("act",))
def apply_affine(y, scale, shift, act="none"):
    return _act(y * scale + shift, act)


# --------------------------------------------------------------------------- #
# Parameters (deterministic)
# --------------------------------------------------------------------------- #
class PG:
    def __init__(self, seed=0):
        self.key = jax.random.PRNGKey(seed)
        self.i = 0

    def _next(self):
        self.i += 1
        return jax.random.fold_in(self.key, self.i)

    def conv(self, shape):
        fan_in = 1
        for s in shape[:-1]:
            fan_in *= s
        std = (2.0 / max(fan_in, 1)) ** 0.5
        return (std * jax.random.normal(self._next(), shape)).astype(f32)

    def uniform(self, shape):
        return jax.random.uniform(self._next(), shape, f32)


def _ones(shape):
    return jnp.ones(shape, f32)


def _zeros(shape):
    return jnp.zeros(shape, f32)


def embed_kernel(w, K):
    """Zero-embed a kxk kernel into a KxK canvas (same math with pad=(K-1)//2)."""
    k = w.shape[0]
    o = (K - k) // 2
    cfg = ((o, K - k - o), (o, K - k - o)) + ((0, 0),) * (w.ndim - 2)
    return jnp.pad(w, cfg)


def gp_params(pg, group=8):
    cg = 128 // group
    l1w, l2w, l3w, l4w = [], [], [], []
    for k in (3, 5, 7):                       # branch-major fused (branch, group)
        for _g in range(group):
            l1w.append(embed_kernel(pg.conv((k, k, cg, 64)), 7))
            l2w.append(embed_kernel(pg.conv((k, k, 64)), 7))
            l3w.append(embed_kernel(pg.conv((k, k, 64, cg)), 7))
            l4w.append(pg.conv((3, 3, cg, cg)))
    nb = 3 * group
    return {"l1w": jnp.stack(l1w), "l2w": jnp.stack(l2w),
            "l3w": jnp.stack(l3w), "l4w": jnp.stack(l4w),
            "l1g": _ones((nb, 64)), "l1b": _zeros((nb, 64)),
            "l2g": _ones((nb, 64)), "l2b": _zeros((nb, 64)),
            "l3g": _ones((nb, cg)), "l3b": _zeros((nb, cg)),
            "l4g": _ones((nb, cg)), "l4b": _zeros((nb, cg)),
            "c1w": jnp.stack([pg.conv((1, 1, 3 * cg, cg)) for _ in range(group)]),
            "c1b": _zeros((group, cg)),
            "samw": jnp.stack([pg.conv((7, 7, 2, 1)) for _ in range(group)])}


def rb_params(pg, cin, cout, downsample=False):
    p = {"w1": pg.conv((3, 3, cin, cout)), "b1": _zeros((cout,)),
         "g1": _ones((cout,)), "bt1": _zeros((cout,)),
         "w2": pg.conv((3, 3, cout, cout)), "b2": _zeros((cout,)),
         "g2": _ones((cout,)), "bt2": _zeros((cout,))}
    if downsample:
        p["wd"] = pg.conv((cin, cout))
        p["gd"] = _ones((cout,))
        p["btd"] = _zeros((cout,))
    return p


def sem_params(pg):
    return {"wemb": pg.conv((128, 128)), "bemb": _zeros((128,)),
            "att": {"temp": _ones((8, 1, 1)),
                    "wqkv": pg.conv((128, 384)), "bqkv": _zeros((384,)),
                    "wdw": pg.conv((3, 3, 384)), "bdw": _zeros((384,)),
                    "wproj": pg.conv((128, 128)), "bproj": _zeros((128,))},
            "gp": gp_params(pg),
            "cw1": pg.conv((3, 3, 128, 512)), "cg1": _ones((512,)), "cb1": _zeros((512,)),
            "cw2": pg.conv((3, 3, 512)), "cg2": _ones((512,)), "cb2": _zeros((512,)),
            "cw3": pg.conv((3, 3, 512, 128)), "cg3": _ones((128,)), "cb3": _zeros((128,)),
            "cw4": pg.conv((3, 3, 128, 128)), "cb4bias": _zeros((128,)),
            "bng": _ones((128,)), "bnb": _zeros((128,))}


def dsrm_params(pg):
    return {"weight": pg.uniform((2, 2, 128)),          # torch.rand(128,2,2) in HWC
            "gatew": pg.conv((3, 3, 128, 128)),
            "gateg": _ones((128,)), "gateb": _zeros((128,)),
            "rb": rb_params(pg, 128, 128)}


def dem_params(pg):
    return {"ca": {"fc1": pg.conv((128, 16)), "fc2": pg.conv((16, 128))},
            "saw": pg.conv((7, 7, 2, 1)),
            "cca": {"fc1": pg.conv((128, 16)), "fc2": pg.conv((16, 128)),
                    "fc3": pg.conv((256, 128))},
            "csa": {"w1": pg.conv((7, 7, 2, 1)), "w2": pg.conv((7, 7, 2, 1))},
            "rb1": rb_params(pg, 128, 128), "rb2": rb_params(pg, 128, 128)}


def pred_params(pg, cin, cout):
    return {"w1": pg.conv((cin, cin // 2)), "b1": _zeros((cin // 2,)),
            "g": _ones((cin // 2,)), "bt": _zeros((cin // 2,)),
            "w2": pg.conv((cin // 2, cout)), "b2": _zeros((cout,))}


def build_params(pg, num_classes=7):
    enc = [{"w": pg.conv((3, 3, 3, 32)), "g": _ones((32,)), "b": _zeros((32,))},
           {"w": pg.conv((3, 3, 32, 64)), "g": _ones((64,)), "b": _zeros((64,))},
           {"w": pg.conv((3, 3, 64, 128)), "g": _ones((128,)), "b": _zeros((128,))}]
    return {"enc": enc,
            "sem": sem_params(pg),
            "dsrm": dsrm_params(pg),
            "dem": dem_params(pg),
            "rescd": [rb_params(pg, 256, 128, downsample=True)]
                     + [rb_params(pg, 128, 128) for _ in range(5)],
            "cd_pred": pred_params(pg, 128, 1),
            "sem_pred1": pred_params(pg, 128, num_classes),
            "sem_pred2": pred_params(pg, 128, num_classes)}


# --------------------------------------------------------------------------- #
# Module forwards
# --------------------------------------------------------------------------- #
def cd_encoder(x, plist):
    # TODO(synk): cd_Encoder is not defined in the reference source; 3-stage
    # ConvBNReLU6 stub producing the 128-channel H/4 feature consumed by SEM.
    p1, p2, p3 = plist
    y1 = conv2d(x, p1["w"], pad=1)
    s1, t1 = bn_scale_shift(y1, p1["g"], p1["b"])
    y2 = conv2d(y1, p2["w"], pad=1, pre=(s1, t1, "relu6"), stride=2)
    s2, t2 = bn_scale_shift(y2, p2["g"], p2["b"])
    y3 = conv2d(y2, p3["w"], pad=1, pre=(s2, t2, "relu6"), stride=2)
    s3, t3 = bn_scale_shift(y3, p3["g"], p3["b"])
    return apply_affine(y3, s3, t3, act="relu6")


def resblock(x, p):
    y1 = conv2d(x, p["w1"], bias=p["b1"], pad=1)
    s1, t1 = bn_scale_shift(y1, p["g1"], p["bt1"])
    y2 = conv2d(y1, p["w2"], bias=p["b2"], pad=1, pre=(s1, t1, "relu"))
    s2, t2 = bn_scale_shift(y2, p["g2"], p["bt2"])
    if "wd" in p:
        N, H, W, C = x.shape
        idt = pallas_matmul(x.reshape(-1, C), p["wd"]).reshape(N, H, W, -1)
        sd, td = bn_scale_shift(idt, p["gd"], p["btd"])
        idt = apply_affine(idt, sd, td)
    else:
        idt = x
    # bn2 + residual add + relu fused in one Pallas pass
    return scale_shift_act(y2, s2, t2, residual=idt, act="relu")


def channel_attention(x, p):
    avg = jnp.mean(x, axis=(1, 2))
    mx = jnp.max(x, axis=(1, 2))

    def mlp(v):
        h = pallas_matmul(v, p["fc1"], act="relu")
        return pallas_matmul(h, p["fc2"])

    att = jax.nn.sigmoid(mlp(avg) + mlp(mx))
    return att[:, None, None, :]


def spatial_attention(x, w):
    avg = jnp.mean(x, axis=3, keepdims=True)
    mx = jnp.max(x, axis=3, keepdims=True)
    y = conv2d(jnp.concatenate([avg, mx], axis=3), w, pad=3)
    return jax.nn.sigmoid(y)


def cos_channel_attention(x, cos_nc, p):
    avg = jnp.mean(x, axis=(1, 2))
    mx = jnp.max(x, axis=(1, 2))

    def mlp(v):
        h = pallas_matmul(v, p["fc1"], act="relu")
        return pallas_matmul(h, p["fc2"])

    att = jax.nn.sigmoid(mlp(avg) + mlp(mx))
    w = jax.nn.sigmoid(pallas_matmul(jnp.concatenate([att, cos_nc], axis=1),
                                     p["fc3"]))
    out = w * att + (1.0 - w) * cos_nc
    return out[:, None, None, :]


def cos_spatial_attention(x, cos_nhw1, p):
    avg = jnp.mean(x, axis=3, keepdims=True)
    mx = jnp.max(x, axis=3, keepdims=True)
    att = jax.nn.sigmoid(conv2d(jnp.concatenate([avg, mx], axis=3), p["w1"], pad=3))
    w = jax.nn.sigmoid(conv2d(jnp.concatenate([att, cos_nhw1], axis=3), p["w2"], pad=3))
    return w * att + (1.0 - w) * cos_nhw1


def attention_c(x, p):
    N, H, W, C = x.shape
    heads = 8
    ch = C // heads
    qkv = pallas_matmul(x.reshape(-1, C), p["wqkv"], p["bqkv"]).reshape(N, H, W, 3 * C)
    qkv = dwconv2d(qkv, p["wdw"], bias=p["bdw"], pad=1)
    q, k, v = qkv[..., :C], qkv[..., C:2 * C], qkv[..., 2 * C:]

    def reorg(t):  # 'b (head c) h w -> b head c (h w)' from NHWC
        return jnp.transpose(t, (0, 3, 1, 2)).reshape(N, heads, ch, H * W)

    def l2n(t):
        return t / jnp.maximum(jnp.sqrt(jnp.sum(t * t, -1, keepdims=True)), 1e-12)

    q = l2n(reorg(q)) * p["temp"].reshape(1, heads, 1, 1)   # temperature pre-scaled
    k = l2n(reorg(k))
    v = reorg(v)
    out = _attn_jit(q, k, v)                                 # all heads, one call/batch
    out = jnp.transpose(out.reshape(N, C, H, W), (0, 2, 3, 1))
    return pallas_matmul(out.reshape(-1, C), p["wproj"], p["bproj"]).reshape(N, H, W, C)


def sem_group_process(x, p):
    """All 8 group_process modules (and their c3/c5/c7 chains) in fused Pallas calls."""
    N, H, W, C = x.shape
    G = 8
    cg = C // G
    xg = x.reshape(N, H, W, G, cg).transpose(3, 0, 1, 2, 4)          # (8,N,H,W,16)

    y1 = conv2d_g(xg, p["l1w"])                                      # (24,N,H,W,64)
    s1, t1 = bn_scale_shift(y1, p["l1g"], p["l1b"])
    y2 = dwconv2d_g(y1, p["l2w"], pre=(s1, t1, "relu6"))
    s2, t2 = bn_scale_shift(y2, p["l2g"], p["l2b"])
    y3 = conv2d_g(y2, p["l3w"], pre=(s2, t2, "relu6"))
    s3, t3 = bn_scale_shift(y3, p["l3g"], p["l3b"])
    y4 = conv2d_g(y3, p["l4w"], pre=(s3, t3, "relu6"))
    s4, t4 = bn_scale_shift(y4, p["l4g"], p["l4b"])

    # (3 branches, 8 groups, ...) -> per-group concat of branches (C = 48)
    y4 = y4.reshape(3, G, N, H, W, cg).transpose(1, 2, 3, 4, 0, 5).reshape(G, N, H, W, 3 * cg)
    s4 = s4.reshape(3, G, cg).transpose(1, 0, 2).reshape(G, 3 * cg)
    t4 = t4.reshape(3, G, cg).transpose(1, 0, 2).reshape(G, 3 * cg)

    out = conv2d_g(y4, p["c1w"], bias=p["c1b"], pad=0, pre=(s4, t4, "relu6"))
    out = out + xg                                                   # residual per group

    avg = jnp.mean(out, axis=-1, keepdims=True)
    mx = jnp.max(out, axis=-1, keepdims=True)
    sa = conv2d_g(jnp.concatenate([avg, mx], axis=-1), p["samw"], pad=3)
    out = out * jax.nn.sigmoid(sa)

    return out.transpose(1, 2, 3, 0, 4).reshape(N, H, W, C)


def sem_forward(x, p):
    N, H, W, C = x.shape
    x_ori = x
    x = pallas_matmul(x.reshape(-1, C), p["wemb"], p["bemb"]).reshape(N, H, W, C)
    # channel shuffle (groups=8)
    x = x.reshape(N, H, W, 8, C // 8).transpose(0, 1, 2, 4, 3).reshape(N, H, W, C)
    x = attention_c(x, p["att"])
    px = sem_group_process(x, p["gp"])
    # tail: ConvBNReLU(128,512) -> dw512 -> ConvBNReLU(512,128) -> Conv2d(128,128,3)
    y = conv2d(px, p["cw1"], pad=1)
    a1, b1 = bn_scale_shift(y, p["cg1"], p["cb1"])
    y = dwconv2d(y, p["cw2"], pad=1, pre=(a1, b1, "relu6"))
    a2, b2 = bn_scale_shift(y, p["cg2"], p["cb2"])
    y = conv2d(y, p["cw3"], pad=1, pre=(a2, b2, "relu6"))
    a3, b3 = bn_scale_shift(y, p["cg3"], p["cb3"])
    y = conv2d(y, p["cw4"], bias=p["cb4bias"], pad=1, pre=(a3, b3, "relu6"))
    sf, tf = bn_scale_shift(y, p["bng"], p["bnb"])
    # final BN + residual + ReLU fused in one Pallas pass
    return scale_shift_act(y, sf, tf, residual=x_ori, act="relu")


def dsrm_forward(x, p):
    N, H, W, C = x.shape
    xf = jnp.fft.rfft2(x, axes=(1, 2))
    h, wf = xf.shape[1], xf.shape[2]
    xf = jnp.fft.fftshift(xf, axes=(1, 2))
    ctr = xf[:, h // 2 - 1:h // 2 + 1, wf // 2 - 1:wf // 2 + 1, :] * p["weight"]
    xf = xf.at[:, h // 2 - 1:h // 2 + 1, wf // 2 - 1:wf // 2 + 1, :].set(ctr)
    xf = jnp.fft.ifftshift(xf, axes=(1, 2))
    res = jnp.fft.irfft2(xf, s=(H, W), axes=(1, 2))
    g = conv2d(res, p["gatew"], pad=1)
    sg, tg = bn_scale_shift(g, p["gateg"], p["gateb"])
    gate = jax.nn.sigmoid(jax.nn.gelu(apply_affine(g, sg, tg, act="relu6"),
                                      approximate=False))
    res = gmul(x, gate)                                   # sigmoid(gelu(...)) * x
    return resblock(res, p["rb"])


def dem_forward(xA, xB, p):
    def branch(x):
        x = gmul(x, channel_attention(x, p["ca"]))
        x = resblock(x, p["rb1"])
        return gmul(x, spatial_attention(x, p["saw"]))

    xA = branch(xA)
    xB = branch(xB)
    eps = 1e-8
    dot_c = jnp.sum(xA * xB, axis=(1, 2))
    nA = jnp.sqrt(jnp.sum(xA * xA, axis=(1, 2)))
    nB = jnp.sqrt(jnp.sum(xB * xB, axis=(1, 2)))
    cdiff = (1.0 - dot_c / jnp.maximum(nA * nB, eps)) / 2.0
    catt = cos_channel_attention(jnp.abs(xA - xB), cdiff, p["cca"])
    xA = resblock(gmul(xA, catt), p["rb2"])
    xB = resblock(gmul(xB, catt), p["rb2"])
    dot_s = jnp.sum(xA * xB, axis=3)
    nAs = jnp.sqrt(jnp.sum(xA * xA, axis=3))
    nBs = jnp.sqrt(jnp.sum(xB * xB, axis=3))
    sdiff = ((1.0 - dot_s / jnp.maximum(nAs * nBs, eps)) / 2.0)[..., None]
    satt = cos_spatial_attention(jnp.abs(xA - xB), sdiff, p["csa"])
    return gmul(xA, satt), gmul(xB, satt)


def pred_head(x, p):
    N, H, W, C = x.shape
    y = pallas_matmul(x.reshape(-1, C), p["w1"], p["b1"]).reshape(N, H, W, -1)
    s, t = bn_scale_shift(y, p["g"], p["bt"])
    C2 = y.shape[-1]
    out = pallas_matmul(y.reshape(-1, C2), p["w2"], p["b2"],
                        pre=(s, t, "relu"))                 # BN+ReLU fused into 1x1
    return out.reshape(N, H, W, -1)


def ec_mcnet(params, xA_nchw, xB_nchw):
    xA = jnp.transpose(xA_nchw, (0, 2, 3, 1)).astype(f32)
    xB = jnp.transpose(xB_nchw, (0, 2, 3, 1)).astype(f32)
    A3 = cd_encoder(xA, params["enc"])
    B3 = cd_encoder(xB, params["enc"])
    A3 = sem_forward(A3, params["sem"])
    B3 = sem_forward(B3, params["sem"])
    A31 = dsrm_forward(A3, params["dsrm"])
    B31 = dsrm_forward(B3, params["dsrm"])
    A31, B31 = dem_forward(A31, B31, params["dem"])
    cf = jnp.concatenate([A31, B31], axis=-1)
    for bp in params["rescd"]:
        cf = resblock(cf, bp)
    cd = pred_head(cf, params["cd_pred"])
    sA = pred_head(A3, params["sem_pred1"])
    sB = pred_head(B3, params["sem_pred2"])

    def up4(t):
        n, h, w, c = t.shape
        return jax.image.resize(t, (n, 4 * h, 4 * w, c), method="bilinear")

    outs = (up4(cd), up4(sA), up4(sB))
    return tuple(jnp.transpose(o, (0, 3, 1, 2)) for o in outs)   # back to NCHW


# --------------------------------------------------------------------------- #
if __name__ == "__main__":
    key = jax.random.PRNGKey(0)
    kA, kB = jax.random.split(key)
    xA = jax.random.normal(kA, (2, 3, 16, 16), jnp.float32)   # NCHW like PyTorch
    xB = jax.random.normal(kB, (2, 3, 16, 16), jnp.float32)

    params = build_params(PG(0), num_classes=7)
    cd, sA, sB = ec_mcnet(params, xA, xB)
    jax.block_until_ready((cd, sA, sB))

    assert cd.shape == (2, 1, 16, 16)
    assert sA.shape == (2, 7, 16, 16)
    assert sB.shape == (2, 7, 16, 16)
    ok = bool(jnp.all(jnp.isfinite(cd))) and bool(jnp.all(jnp.isfinite(sA))) \
        and bool(jnp.all(jnp.isfinite(sB)))
    assert ok
    print("KERNEL_OK")
</pallas_src>

<mosaic_0001>
module attributes {stable_mosaic.version = 11 : i64} {
  func.func @_conv_kernel(%arg0: i32, %arg1: i32, %arg2: i32, %arg3: memref<1x1x18x18x3xf32, #tpu.memory_space<vmem>>, %arg4: memref<1x9x3x32xf32, #tpu.memory_space<vmem>>, %arg5: memref<1x1x16x16x32xf32, #tpu.memory_space<vmem>>) attributes {dimension_semantics = [#tpu.dimension_semantics<parallel>, #tpu.dimension_semantics<parallel>, #tpu.dimension_semantics<parallel>], iteration_bounds = array<i64: 1, 1, 2>, scalar_prefetch = 0 : i64, scratch_operands = 0 : i64, tpu.core_type = #tpu.core_type<tc>, window_params = [{transform_indices = @transform_0, window_bounds = array<i64: 1, 1, 18, 18, 3>}, {transform_indices = @transform_1, window_bounds = array<i64: 1, 9, 3, 32>}, {transform_indices = @transform_2, window_bounds = array<i64: 1, 1, 16, 16, 32>}]} {
    %c0 = arith.constant 0 : index
    %c0_0 = arith.constant 0 : index
    %c0_1 = arith.constant 0 : index
    %c0_2 = arith.constant 0 : index
    %c0_3 = arith.constant 0 : index
    %0 = vector.load %arg3[%c0, %c0_0, %c0_1, %c0_2, %c0_3] : memref<1x1x18x18x3xf32, #tpu.memory_space<vmem>>, vector<1x1x18x18x3xf32>
    %1 = vector.shape_cast %0 : vector<1x1x18x18x3xf32> to vector<18x18x3xf32>
    %2 = arith.truncf %1 : vector<18x18x3xf32> to vector<18x18x3xbf16>
    %c0_4 = arith.constant 0 : index
    %c0_5 = arith.constant 0 : index
    %c0_6 = arith.constant 0 : index
    %c0_7 = arith.constant 0 : index
    %3 = vector.load %arg4[%c0_4, %c0_5, %c0_6, %c0_7] : memref<1x9x3x32xf32, #tpu.memory_space<vmem>>, vector<1x9x3x32xf32>
    %4 = vector.shape_cast %3 : vector<1x9x3x32xf32> to vector<9x3x32xf32>
    %5 = arith.truncf %4 : vector<9x3x32xf32> to vector<9x3x32xbf16>
    %6 = vector.extract_strided_slice %2 {offsets = [0, 0, 0], sizes = [18, 16, 3], strides = [1, 1, 1]} : vector<18x18x3xbf16> to vector<18x16x3xbf16>
    %7 = vector.extract_strided_slice %2 {offsets = [0, 1, 0], sizes = [18, 16, 3], strides = [1, 1, 1]} : vector<18x18x3xbf16> to vector<18x16x3xbf16>
    %8 = vector.extract_strided_slice %2 {offsets = [0, 2, 0], sizes = [18, 16, 3], strides = [1, 1, 1]} : vector<18x18x3xbf16> to vector<18x16x3xbf16>
    %9 = vector.extract_strided_slice %6 {offsets = [0, 0, 0], sizes = [16, 16, 3], strides = [1, 1, 1]} : vector<18x16x3xbf16> to vector<16x16x3xbf16>
    %10 = vector.shape_cast %9 : vector<16x16x3xbf16> to vector<256x3xbf16>
    %11 = vector.extract_strided_slice %5 {offsets = [0, 0, 0], sizes = [1, 3, 32], strides = [1, 1, 1]} : vector<9x3x32xbf16> to vector<1x3x32xbf16>
    %12 = vector.shape_cast %11 : vector<1x3x32xbf16> to vector<3x32xbf16>
    %cst = arith.constant dense<0.000000e+00> : vector<256x32xf32>
    %13 = tpu.matmul %10, %12, %cst {dimension_numbers = #tpu.dot_dimension_numbers<[1], [0], [0], [1], [0, 0, 1, 1], [], []>} : vector<256x3xbf16>, vector<3x32xbf16>, vector<256x32xf32> -> vector<256x32xf32>
    %14 = vector.extract_strided_slice %7 {offsets = [0, 0, 0], sizes = [16, 16, 3], strides = [1, 1, 1]} : vector<18x16x3xbf16> to vector<16x16x3xbf16>
    %15 = vector.shape_cast %14 : vector<16x16x3xbf16> to vector<256x3xbf16>
    %16 = vector.extract_strided_slice %5 {offsets = [1, 0, 0], sizes = [1, 3, 32], strides = [1, 1, 1]} : vector<9x3x32xbf16> to vector<1x3x32xbf16>
    %17 = vector.shape_cast %16 : vector<1x3x32xbf16> to vector<3x32xbf16>
    %cst_8 = arith.constant dense<0.000000e+00> : vector<256x32xf32>
    %18 = tpu.matmul %15, %17, %cst_8 {dimension_numbers = #tpu.dot_dimension_numbers<[1], [0], [0], [1], [0, 0, 1, 1], [], []>} : vector<256x3xbf16>, vector<3x32xbf16>, vector<256x32xf32> -> vector<256x32xf32>
    %19 = arith.addf %13, %18 : vector<256x32xf32>
    %20 = vector.extract_strided_slice %8 {offsets = [0, 0, 0], sizes = [16, 16, 3], strides = [1, 1, 1]} : vector<18x16x3xbf16> to vector<16x16x3xbf16>
    %21 = vector.shape_cast %20 : vector<16x16x3xbf16> to vector<256x3xbf16>
    %22 = vector.extract_strided_slice %5 {offsets = [2, 0, 0], sizes = [1, 3, 32], strides = [1, 1, 1]} : vector<9x3x32xbf16> to vector<1x3x32xbf16>
    %23 = vector.shape_cast %22 : vector<1x3x32xbf16> to vector<3x32xbf16>
    %cst_9 = arith.constant dense<0.000000e+00> : vector<256x32xf32>
    %24 = tpu.matmul %21, %23, %cst_9 {dimension_numbers = #tpu.dot_dimension_numbers<[1], [0], [0], [1], [0, 0, 1, 1], [], []>} : vector<256x3xbf16>, vector<3x32xbf16>, vector<256x32xf32> -> vector<256x32xf32>
    %25 = arith.addf %19, %24 : vector<256x32xf32>
    %26 = vector.extract_strided_slice %6 {offsets = [1, 0, 0], sizes = [16, 16, 3], strides = [1, 1, 1]} : vector<18x16x3xbf16> to vector<16x16x3xbf16>
    %27 = vector.shape_cast %26 : vector<16x16x3xbf16> to vector<256x3xbf16>
    %28 = vector.extract_strided_slice %5 {offsets = [3, 0, 0], sizes = [1, 3, 32], strides = [1, 1, 1]} : vector<9x3x32xbf16> to vector<1x3x32xbf16>
    %29 = vector.shape_cast %28 : vector<1x3x32xbf16> to vector<3x32xbf16>
    %cst_10 = arith.constant dense<0.000000e+00> : vector<256x32xf32>
    %30 = tpu.matmul %27, %29, %cst_10 {dimension_numbers = #tpu.dot_dimension_numbers<[1], [0], [0], [1], [0, 0, 1, 1], [], []>} : vector<256x3xbf16>, vector<3x32xbf16>, vector<256x32xf32> -> vector<256x32xf32>
    %31 = arith.addf %25, %30 : vector<256x32xf32>
    %32 = vector.extract_strided_slice %7 {offsets = [1, 0, 0], sizes = [16, 16, 3], strides = [1, 1, 1]} : vector<18x16x3xbf16> to vector<16x16x3xbf16>
    %33 = vector.shape_cast %32 : vector<16x16x3xbf16> to vector<256x3xbf16>
    %34 = vector.extract_strided_slice %5 {offsets = [4, 0, 0], sizes = [1, 3, 32], strides = [1, 1, 1]} : vector<9x3x32xbf16> to vector<1x3x32xbf16>
    %35 = vector.shape_cast %34 : vector<1x3x32xbf16> to vector<3x32xbf16>
    %cst_11 = arith.constant dense<0.000000e+00> : vector<256x32xf32>
    %36 = tpu.matmul %33, %35, %cst_11 {dimension_numbers = #tpu.dot_dimension_numbers<[1], [0], [0], [1], [0, 0, 1, 1], [], []>} : vector<256x3xbf16>, vector<3x32xbf16>, vector<256x32xf32> -> vector<256x32xf32>
    %37 = arith.addf %31, %36 : vector<256x32xf32>
    %38 = vector.extract_strided_slice %8 {offsets = [1, 0, 0], sizes = [16, 16, 3], strides = [1, 1, 1]} : vector<18x16x3xbf16> to vector<16x16x3xbf16>
    %39 = vector.shape_cast %38 : vector<16x16x3xbf16> to vector<256x3xbf16>
    %40 = vector.extract_strided_slice %5 {offsets = [5, 0, 0], sizes = [1, 3, 32], strides = [1, 1, 1]} : vector<9x3x32xbf16> to vector<1x3x32xbf16>
    %41 = vector.shape_cast %40 : vector<1x3x32xbf16> to vector<3x32xbf16>
    %cst_12 = arith.constant dense<0.000000e+00> : vector<256x32xf32>
    %42 = tpu.matmul %39, %41, %cst_12 {dimension_numbers = #tpu.dot_dimension_numbers<[1], [0], [0], [1], [0, 0, 1, 1], [], []>} : vector<256x3xbf16>, vector<3x32xbf16>, vector<256x32xf32> -> vector<256x32xf32>
    %43 = arith.addf %37, %42 : vector<256x32xf32>
    %44 = vector.extract_strided_slice %6 {offsets = [2, 0, 0], sizes = [16, 16, 3], strides = [1, 1, 1]} : vector<18x16x3xbf16> to vector<16x16x3xbf16>
    %45 = vector.shape_cast %44 : vector<16x16x3xbf16> to vector<256x3xbf16>
    %46 = vector.extract_strided_slice %5 {offsets = [6, 0, 0], sizes = [1, 3, 32], strides = [1, 1, 1]} : vector<9x3x32xbf16> to vector<1x3x32xbf16>
    %47 = vector.shape_cast %46 : vector<1x3x32xbf16> to vector<3x32xbf16>
    %cst_13 = arith.constant dense<0.000000e+00> : vector<256x32xf32>
    %48 = tpu.matmul %45, %47, %cst_13 {dimension_numbers = #tpu.dot_dimension_numbers<[1], [0], [0], [1], [0, 0, 1, 1], [], []>} : vector<256x3xbf16>, vector<3x32xbf16>, vector<256x32xf32> -> vector<256x32xf32>
    %49 = arith.addf %43, %48 : vector<256x32xf32>
    %50 = vector.extract_strided_slice %7 {offsets = [2, 0, 0], sizes = [16, 16, 3], strides = [1, 1, 1]} : vector<18x16x3xbf16> to vector<16x16x3xbf16>
    %51 = vector.shape_cast %50 : vector<16x16x3xbf16> to vector<256x3xbf16>
    %52 = vector.extract_strided_slice %5 {offsets = [7, 0, 0], sizes = [1, 3, 32], strides = [1, 1, 1]} : vector<9x3x32xbf16> to vector<1x3x32xbf16>
    %53 = vector.shape_cast %52 : vector<1x3x32xbf16> to vector<3x32xbf16>
    %cst_14 = arith.constant dense<0.000000e+00> : vector<256x32xf32>
    %54 = tpu.matmul %51, %53, %cst_14 {dimension_numbers = #tpu.dot_dimension_numbers<[1], [0], [0], [1], [0, 0, 1, 1], [], []>} : vector<256x3xbf16>, vector<3x32xbf16>, vector<256x32xf32> -> vector<256x32xf32>
    %55 = arith.addf %49, %54 : vector<256x32xf32>
    %56 = vector.extract_strided_slice %8 {offsets = [2, 0, 0], sizes = [16, 16, 3], strides = [1, 1, 1]} : vector<18x16x3xbf16> to vector<16x16x3xbf16>
    %57 = vector.shape_cast %56 : vector<16x16x3xbf16> to vector<256x3xbf16>
    %58 = vector.extract_strided_slice %5 {offsets = [8, 0, 0], sizes = [1, 3, 32], strides = [1, 1, 1]} : vector<9x3x32xbf16> to vector<1x3x32xbf16>
    %59 = vector.shape_cast %58 : vector<1x3x32xbf16> to vector<3x32xbf16>
    %cst_15 = arith.constant dense<0.000000e+00> : vector<256x32xf32>
    %60 = tpu.matmul %57, %59, %cst_15 {dimension_numbers = #tpu.dot_dimension_numbers<[1], [0], [0], [1], [0, 0, 1, 1], [], []>} : vector<256x3xbf16>, vector<3x32xbf16>, vector<256x32xf32> -> vector<256x32xf32>
    %61 = arith.addf %55, %60 : vector<256x32xf32>
    %62 = vector.shape_cast %61 : vector<256x32xf32> to vector<16x16x32xf32>
    %c0_16 = arith.constant 0 : index
    %c0_17 = arith.constant 0 : index
    %c0_18 = arith.constant 0 : index
    %c0_19 = arith.constant 0 : index
    %c0_20 = arith.constant 0 : index
    %63 = vector.load %arg5[%c0_16, %c0_17, %c0_18, %c0_19, %c0_20] : memref<1x1x16x16x32xf32, #tpu.memory_space<vmem>>, vector<1x1x16x16x32xf32>
    %64 = vector.shape_cast %63 : vector<1x1x16x16x32xf32> to vector<16x16x32xf32>
    %65 = vector.shape_cast %62 : vector<16x16x32xf32> to vector<1x1x16x16x32xf32>
    tpu.vector_store %arg5[%c0_16, %c0_17, %c0_18, %c0_19, %c0_20], %65 {strides = array<i32>} : memref<1x1x16x16x32xf32, #tpu.memory_space<vmem>>, vector<1x1x16x16x32xf32>,
    return
  }
  func.func @transform_0(%arg0: i32, %arg1: i32, %arg2: i32) -> (i32, i32, i32, i32, i32) {
    %c0_i32 = arith.constant 0 : i32
    %c0_i32_0 = arith.constant 0 : i32
    %c0_i32_1 = arith.constant 0 : i32
    %c0_i32_2 = arith.constant 0 : i32
    return %arg1, %arg2, %c0_i32, %c0_i32_0, %c0_i32_1 : i32, i32, i32, i32, i32
  }
  func.func @transform_1(%arg0: i32, %arg1: i32, %arg2: i32) -> (i32, i32, i32, i32) {
    %c1_i32 = arith.constant 1 : i32
    %0 = arith.muli %arg0, %c1_i32 : i32
    %1 = arith.addi %0, %arg1 : i32
    %c0_i32 = arith.constant 0 : i32
    %c0_i32_0 = arith.constant 0 : i32
    %c0_i32_1 = arith.constant 0 : i32
    %c0_i32_2 = arith.constant 0 : i32
    return %1, %c0_i32, %c0_i32_0, %c0_i32_1 : i32, i32, i32, i32
  }
  func.func @transform_2(%arg0: i32, %arg1: i32, %arg2: i32) -> (i32, i32, i32, i32, i32) {
    %c1_i32 = arith.constant 1 : i32
    %0 = arith.muli %arg0, %c1_i32 : i32
    %1 = arith.addi %0, %arg1 : i32
    %c0_i32 = arith.constant 0 : i32
    %c0_i32_0 = arith.constant 0 : i32
    %c0_i32_1 = arith.constant 0 : i32
    %c0_i32_2 = arith.constant 0 : i32
    return %1, %arg2, %c0_i32, %c0_i32_0, %c0_i32_1 : i32, i32, i32, i32, i32
  }
}

</mosaic_0001>

<bundles_post_ra>
// kernel: _conv_g_jit.1
= control target key start
LH: loop header
LB: loop body
LE: loop exit
PB: predicated region body
PF: predicated region fallthrough
CT: control target
= control target key end

     0   :  { %7 = vsyncpa [#allocation3], 0  ;;  %s4715_s0 = inlined_call_operand.vmem [shape: f32[1,2,18,18,3], index: 0, kind: input, shape index: {}]   ;;  %s4716_s1 = inlined_call_operand.vmem [shape: f32[1,9,3,32], index: 1, kind: input, shape index: {}]   ;;  %s4717_s2 = inlined_call_operand.hbm [shape: f32[1,2,16,16,32], index: 2, kind: output, shape index: {}]  }
   0x1   :  { %9 = vsyncpa [#allocation3 + $0x1], 0  ;;  %s3399_s9 = smov 0   ;;  %s3401_s10 = smov 0  }
   0x2   :  { %s3403_s11 = smov 0   ;;  %s3405_s12 = smov 0  }
   0x3   :  { %s3407_s13 = smov 0   ;;  %s3409_s14 = smov 0  }
   0x4 LB: > { %s2624_s15 = sadd.s32 4294967295, %s3378_s14   ;;  %s2625_s16 = sadd.s32 4294967294, %s3378_s14   ;;  %s3378_s14 = sphi %s3409_s14, %s15_s14   ;;  %s3374_s13 = sphi %s3407_s13, %s4833_s13   ;;  %s3370_s12 = sphi %s3405_s12, %s4832_s12   ;;  %s3366_s11 = sphi %s3403_s11, %s4831_s11   ;;  %s3362_s10 = sphi %s3401_s10, %s4830_s10   ;;  %s3358_s9 = sphi %s3399_s9, %s4829_s9  }
   0x5   : > { %s27_s17 = sadd.s32 1, %s3374_s13  ;;  %s101_s18 = sadd.s32 1, %s3366_s11 }
   0x6   : > { %p28_p0 = scmp.ge.s32.totalorder %s27_s17, 2  ;;  %p111_p1 = scmp.ne.s32.totalorder %s3366_s11, %s3362_s10 }
   0x7   : > { %p112_p2 = scmp.eq.s32.totalorder %s2624_s15, 1  ;;  %p117_p3 = scmp.ne.s32.totalorder %s3362_s10, %s3358_s9 }
   0x8   : > { %s4835_s17 = smov (%p28_p0, %s27_s17), 0  ;;  %p118_p5 = scmp.eq.s32.totalorder %s2625_s16, 1 }
   0x9   : > { %p3439_p4 = por %p112_p2, %p111_p1  ;;  %s97_s20 = ssub.s32 %s3374_s13, %s4835_s17 }
   0xa   : > { %p2629_p6 = scmp.ge.s32.totalorder %s3378_s14, 1  ;;  %p99_p7 = scmp.eq.s32.totalorder %s97_s20, 0 }
   0xb   : > { %p3446_p8 = por %p118_p5, %p117_p3  ;;  %p158_p9 = scmp.lt.s32.totalorder %s3378_s14, 3 }
   0xc   : > { %s3452_s22 = scalar_select %p99_p7, %s3366_s11, %s101_s18  }
   0xd   : > { %p159_p10 = pnand %p2629_p6, %p158_p9 }
   0xf   : > { %162 = sbr.rel (%p159_p10) target bundleno = 542 (0x21e), region = 28 }
  0x14   : > { %v299_v0 = vld [vmem:[%s4716_s1 + $0x4] sm:$0x7]  ;;  %vm558_vm0 = vcmask 1040384   ;;  %vm559_vm1 = vcmask 1041408   ;;  %p192_p11 = scmp.lt.s32.totalorder %s3370_s12, 1  ;;  %v3380_v2 = vmov 65535  }
  0x15   : > { %v308_v1 = vpack.c.bf16 %v299_v0, %v299_v0  ;;  %v560_v3 = vsel %vm558_vm0, 4294967295, %v3380_v2  ;;  %v298_v4 = vld [vmem:[%s4716_s1] sm:$0x7]  ;;  %v300_v7 = vld [vmem:[%s4716_s1 + $0x8] sm:$0x7]  ;;  %vm509_vm3 = vcmask 23552  }
  0x16   : > { %v3461_v5 = vsel %vm559_vm1, %v560_v3, 0  ;;  %s193_s27 = scalar_select %p192_p11, %s3370_s12, 1  ;;  %v307_v6 = vpack.c.bf16 %v298_v4, %v298_v4  ;;  %v309_v9 = vpack.c.bf16 %v300_v7, %v300_v7  ;;  %v301_v10 = vld [vmem:[%s4716_s1 + $0xc] sm:$0x7]  ;;  %v302_v14 = vld [vmem:[%s4716_s1 + $0x10] sm:$0x7] }
  0x17   : > { %v563_v8 = vand.u32 %v3461_v5, %v308_v1  ;;  %v310_v13 = vpack.c.bf16 %v301_v10, %v301_v10  ;;  %vm316_vm2 = vsmask.f32 7424  ;;  %v311_v29 = vpack.c.bf16 %v302_v14, %v302_v14  ;;  %s187_s28 = sand.u32 1, %s3362_s10   ;;  %s2781_s3 = sshll.u32 %s3370_s12, 12 }
  0x18   : > { %s3243_s4 = smul.u32 432, %s193_s27  ;;  %v3472_v11 = vand.u32 %v3461_v5, %v307_v6  ;;  %v3475_v12 = vand.u32 %v3461_v5, %v309_v9  ;;  %vm954_vm4 = vcmask 1046528   ;;  %s2630_s29 = sshll.u32 %s187_s28, 8  ;;  %vm2473_vm5 = vcmask 261120  }
  0x19   : > { %3241 = vmatprep.subr.bf16.mxu1 %v563_v8  ;;  %2935 = vmatprep.subr.bf16.mxu0 %v563_v8  ;;  %v3505_v28 = vand.u32 %v3461_v5, %v310_v13  ;;  %v3527_v51 = vand.u32 %v3461_v5, %v311_v29  ;;  %s4513_s30 = scalar_lea.vmem [#allocation2], %s2630_s29  ;;  %s4670_s12 = scalar_lea.sflag [#allocation3], %s187_s28 }
  0x1a   : > { %3242 = vmatpush3.bf16.msra.mxu1 %v563_v8  ;;  %2936 = vmatpush3.bf16.msra.mxu0 %v563_v8  ;;  %s3480_s7 = scalar_lea.vmem %s4715_s0, %s3243_s4  ;;  %s2523_s4 = sshll.u32 %s4513_s30, 4  ;;  %s4662_s4 = int_to_ptr.vmem [resolvable:$true] %s2523_s4 }
  0x1b   : > { %v208_v15 = vld [vmem:[%s3480_s7] sm:$0xff]  ;;  %v209_v16 = vld [vmem:[%s3480_s7 + $0x8] sm:$0xff]  ;;  %v210_v17 = vld [vmem:[%s3480_s7 + $0x10] sm:$0x3]  ;;  %2969 = vmatprep.subr.bf16.mxu1 %v3472_v11  ;;  %3003 = vmatprep.subr.bf16.mxu0 %v3475_v12  ;;  %s3302_s8 = scalar_lea.vmem %s4662_s4, 4096  ;;  %s3381_s15 = smov [#allocation2]  }
  0x1c   : > { %v3490_v18 = vpack.c.bf16 %v209_v16, %v208_v15  ;;  %v3492_v19 = vpack.c.bf16 %v210_v17, %v210_v17  ;;  %v232_v20 = vld [vmem:[%s3480_s7 + $0xc0] sm:$0xff]  ;;  %v233_v21 = vld [vmem:[%s3480_s7 + $0xc8] sm:$0xff]  ;;  %v234_v22 = vld [vmem:[%s3480_s7 + $0xd0] sm:$0x3]  ;;  %p3303_p12 = scmp.ne.s32.totalorder %s4662_s4, %s3302_s8  ;;  %s3306_s16 = sshll.u32 %s3381_s15, 4  ;;  %s3307_s16 = int_to_ptr.vmem [resolvable:$false] %s3306_s16 }
  0x1d   : > { %v3497_v23 = vpack.c.bf16 %v233_v21, %v232_v20  ;;  %v3499_v24 = vpack.c.bf16 %v234_v22, %v234_v22  ;;  %v211_v25 = vld [vmem:[%s3480_s7 + $0x18] sm:$0xff]  ;;  %v212_v26 = vld [vmem:[%s3480_s7 + $0x20] sm:$0xff]  ;;  %v213_v27 = vld [vmem:[%s3480_s7 + $0x28] sm:$0x3]  ;;  %s3308_s18 = scalar_lea.vmem %s3307_s16, 8192  ;;  %p3309_p1 = scmp.lt.s32.totalorder %s4662_s4, %s3307_s16 }
  0x1e   : > { %v318_v30 = vshrl.u32 %v3490_v18, 16  ;;  %v320_v31 = vshll.u32 %v3490_v18, 16  ;;  %v325_v32 = vshll.u32 %v3492_v19, 16  ;;  %v3510_v33 = vpack.c.bf16 %v212_v26, %v211_v25  ;;  %v235_v34 = vld [vmem:[%s3480_s7 + $0xd8] sm:$0xff]  ;;  %v236_v35 = vld [vmem:[%s3480_s7 + $0xe0] sm:$0xff]  ;;  %v214_v36 = vld [vmem:[%s3480_s7 + $0x30] sm:$0xff]  ;;  %p3304_p13 = pnand %p3303_p12, %p3439_p4  ;;  %p3310_p2 = scmp.lt.s32.totalorder %s3308_s18, %s3302_s8 }
  0x1f   : > { %v414_v37 = vshrl.u32 %v3497_v23, 16  ;;  %v416_v38 = vshll.u32 %v3497_v23, 16  ;;  %v421_v39 = vshll.u32 %v3499_v24, 16  ;;  %v3518_v40 = vpack.c.bf16 %v213_v27, %v213_v27  ;;  %v237_v41 = vld [vmem:[%s3480_s7 + $0xe8] sm:$0x3]  ;;  %v215_v42 = vld [vmem:[%s3480_s7 + $0x38] sm:$0xff] }
  0x20   : > { %v322_v43 = vrot.slane %v320_v31, 1  ;;  %v327_v44 = vrot.slane %v325_v32, 1  ;;  %v330_v45 = vshrl.u32 %v3510_v33, 16  ;;  %v332_v46 = vshll.u32 %v3510_v33, 16  ;;  %v216_v47 = vld [vmem:[%s3480_s7 + $0x40] sm:$0x3]  ;;  %p3305_p0 = pneg %p3304_p13  ;;  %p3311_p3 = por %p3310_p2, %p3309_p1 }
  0x21   : > { %v418_v48 = vrot.slane %v416_v38, 1  ;;  %v423_v49 = vrot.slane %v421_v39, 1  ;;  %v337_v50 = vshll.u32 %v3518_v40, 16  ;;  %v3529_v54 = vpack.c.bf16 %v236_v35, %v235_v34  ;;  %v238_v60 = vld [vmem:[%s3480_s7 + $0xf0] sm:$0xff]  ;;  %v239_v61 = vld [vmem:[%s3480_s7 + $0xf8] sm:$0xff]  ;;  %v217_v3 = vld [vmem:[%s3480_s7 + $0x48] sm:$0xff] }
  0x22   : > { %v323_v52 = vor.u32 %v322_v43, %v318_v30  ;;  %v334_v53 = vrot.slane %v332_v46, 1  ;;  %v3531_v55 = vpack.c.bf16 %v237_v41, %v237_v41  ;;  %v3533_v58 = vpack.c.bf16 %v215_v42, %v214_v36  ;;  %v240_v2 = vld [vmem:[%s3480_s7 + $0x100] sm:$0x3]  ;;  %v218_v4 = vld [vmem:[%s3480_s7 + $0x50] sm:$0xff]  ;;  %v219_v16 = vld [vmem:[%s3480_s7 + $0x58] sm:$0x3]  ;;  %p3312_p5 = pnand %p3311_p3, %p3305_p0 }
  0x23   : > { %v419_v56 = vor.u32 %v418_v48, %v414_v37  ;;  %v339_v57 = vrot.slane %v337_v50, 1  ;;  %v3535_v59 = vpack.c.bf16 %v216_v47, %v216_v47  ;;  %v426_v0 = vshrl.u32 %v3529_v54, 16  ;;  %v241_v25 = vld [vmem:[%s3480_s7 + $0x108] sm:$0xff]  ;;  %v242_v26 = vld [vmem:[%s3480_s7 + $0x110] sm:$0xff]  ;;  %v243_v32 = vld [vmem:[%s3480_s7 + $0x118] sm:$0x3] }
  0x24   : > { %v328_v62 = vsel %vm316_vm2, %v323_v52, %v327_v44  ;;  %v335_v63 = vor.u32 %v334_v53, %v330_v45  ;;  %v428_v1 = vshll.u32 %v3529_v54, 16  ;;  %v433_v7 = vshll.u32 %v3531_v55, 16  ;;  %v220_v42 = vld [vmem:[%s3480_s7 + $0x60] sm:$0xff]  ;;  %v221_v43 = vld [vmem:[%s3480_s7 + $0x68] sm:$0xff]  ;;  %v222_v44 = vld [vmem:[%s3480_s7 + $0x70] sm:$0x3] }
  0x25   : > { %2937 = vmatprep.mubr.msk.bf16.mxu0 %vm509_vm3, %v328_v62  ;;  %v3547_v6 = vsel %vm316_vm2, %v419_v56, %v423_v49  ;;  %v342_v8 = vshrl.u32 %v3533_v58, 16  ;;  %v344_v9 = vshll.u32 %v3533_v58, 16  ;;  %v349_v14 = vshll.u32 %v3535_v59, 16  ;;  %v244_v49 = vld [vmem:[%s3480_s7 + $0x120] sm:$0xff]  ;;  %v245_v50 = vld [vmem:[%s3480_s7 + $0x128] sm:$0xff] }
  0x26   : > { %2953 = vmatprep.mubr.msk.bf16.mxu1 %vm509_vm3, %v3547_v6  ;;  %v3555_v10 = vsel %vm316_vm2, %v335_v63, %v339_v57  ;;  %v430_v13 = vrot.slane %v428_v1, 1  ;;  %v3558_v15 = vpack.c.bf16 %v239_v61, %v238_v60  ;;  %v435_v17 = vrot.slane %v433_v7, 1  ;;  %v224_v7 = vld [vmem:[%s3480_s7 + $0x80] sm:$0xff] }
  0x27   : > { %2938 = vmatmul.mubr.msk.bf16.vlgmr.msra.gmra.mxu0 %vm509_vm3, %v3555_v10  ;;  %v346_v20 = vrot.slane %v344_v9, 1  ;;  %v3563_v21 = vpack.c.bf16 %v240_v2, %v240_v2  ;;  %v3565_v22 = vpack.c.bf16 %v218_v4, %v217_v3  ;;  %v351_v29 = vrot.slane %v349_v14, 1  ;;  %v223_v4 = vld [vmem:[%s3480_s7 + $0x78] sm:$0xff] }
  0x28   : > { %v431_v27 = vor.u32 %v430_v13, %v426_v0  ;;  %3004 = vmatpush3.bf16.msra.mxu0 %v3475_v12  ;;  %v438_v30 = vshrl.u32 %v3558_v15, 16  ;;  %v440_v31 = vshll.u32 %v3558_v15, 16  ;;  %v3574_v36 = vpack.c.bf16 %v219_v16, %v219_v16 }
  0x29   : > { %v347_v34 = vor.u32 %v346_v20, %v342_v8  ;;  %v445_v35 = vshll.u32 %v3563_v21, 16  ;;  %v354_v37 = vshrl.u32 %v3565_v22, 16  ;;  %3071 = vmatprep.subr.bf16.mxu0 %v3527_v51  ;;  %v356_v39 = vshll.u32 %v3565_v22, 16  ;;  %v225_v8 = vld [vmem:[%s3480_s7 + $0x88] sm:$0x3]  ;;  %v248_v20 = vld [vmem:[%s3480_s7 + $0x140] sm:$0xff] }
  0x2a   : > { %v3579_v12 = vsel %vm316_vm2, %v431_v27, %v435_v17  ;;  %v442_v38 = vrot.slane %v440_v31, 1  ;;  %v3582_v41 = vpack.c.bf16 %v242_v26, %v241_v25  ;;  %v361_v47 = vshll.u32 %v3574_v36, 16  ;;  %v247_v17 = vld [vmem:[%s3480_s7 + $0x138] sm:$0xff] }
  0x2b   : > { %2954 = vmatmul.mubr.msk.bf16.vlgmr.msra.gmra.mxu1 %vm509_vm3, %v3579_v12  ;;  %v3590_v45 = vsel %vm316_vm2, %v347_v34, %v351_v29  ;;  %v447_v46 = vrot.slane %v445_v35, 1  ;;  %v3593_v48 = vpack.c.bf16 %v243_v32, %v243_v32  ;;  %v358_v53 = vrot.slane %v356_v39, 1  ;;  %v249_v35 = vld [vmem:[%s3480_s7 + $0x148] sm:$0x3] }
  0x2c   : > { %2970 = vmatpush3.bf16.msra.mxu1 %v3472_v11  ;;  %2941 = vmatprep.mubr.msk.bf16.mxu0 %vm509_vm3, %v3590_v45  ;;  %v443_v52 = vor.u32 %v442_v38, %v438_v30  ;;  %v450_v56 = vshrl.u32 %v3582_v41, 16  ;;  %v452_v57 = vshll.u32 %v3582_v41, 16  ;;  %v363_v60 = vrot.slane %v361_v47, 1  ;;  %v246_v11 = vld [vmem:[%s3480_s7 + $0x130] sm:$0x3] }
  0x2d   : > { %v457_v61 = vshll.u32 %v3593_v48, 16  ;;  %v3603_v62 = vpack.c.bf16 %v221_v43, %v220_v42  ;;  %v3605_v63 = vpack.c.bf16 %v222_v44, %v222_v44  ;;  %3037 = vmatprep.subr.bf16.mxu1 %v3505_v28  ;;  %v359_v1 = vor.u32 %v358_v53, %v354_v37  ;;  %v226_v43 = vld [vmem:[%s3480_s7 + $0x90] sm:$0xff] }
  0x2e   : > { %v3610_v0 = vsel %vm316_vm2, %v443_v52, %v447_v46  ;;  %v454_v2 = vrot.slane %v452_v57, 1  ;;  %v3612_v3 = vpack.c.bf16 %v245_v50, %v244_v49  ;;  %v3627_v27 = vpack.c.bf16 %v246_v11, %v246_v11  ;;  %v227_v50 = vld [vmem:[%s3480_s7 + $0x98] sm:$0xff]  ;;  %v228_v52 = vld [vmem:[%s3480_s7 + $0xa0] sm:$0x3] }
  0x2f   : > { %2957 = vmatprep.mubr.msk.bf16.mxu1 %vm509_vm3, %v3610_v0  ;;  %v459_v9 = vrot.slane %v457_v61, 1  ;;  %v366_v13 = vshrl.u32 %v3603_v62, 16  ;;  %v368_v14 = vshll.u32 %v3603_v62, 16  ;;  %v373_v16 = vshll.u32 %v3605_v63, 16  ;;  %v250_v61 = vld [vmem:[%s3480_s7 + $0x150] sm:$0xff]  ;;  %v251_v11 = vld [vmem:[%s3480_s7 + $0x158] sm:$0xff] }
  0x30   : > { %v3625_v25 = vsel %vm316_vm2, %v359_v1, %v363_v60  ;;  %v455_v26 = vor.u32 %v454_v2, %v450_v56  ;;  %v462_v29 = vshrl.u32 %v3612_v3, 16  ;;  %v464_v32 = vshll.u32 %v3612_v3, 16 }
  0x31   : > { %2942 = vmatmul.mubr.msk.bf16.gmra.mxu0 %vm509_vm3, %v3625_v25  ;;  %v370_v30 = vrot.slane %v368_v14, 1  ;;  %v375_v31 = vrot.slane %v373_v16, 1  ;;  %v3633_v34 = vpack.c.bf16 %v224_v7, %v223_v4  ;;  %v469_v38 = vshll.u32 %v3627_v27, 16  ;;  %v252_v16 = vld [vmem:[%s3480_s7 + $0x160] sm:$0x3] }
  0x32   : > { %v3637_v37 = vsel %vm316_vm2, %v455_v26, %v459_v9  ;;  %v3640_v39 = vpack.c.bf16 %v225_v8, %v225_v8  ;;  %v3642_v42 = vpack.c.bf16 %v248_v20, %v247_v17  ;;  %v466_v46 = vrot.slane %v464_v32, 1  ;;  %v231_v32 = vld [vmem:[%s3480_s7 + $0xb8] sm:$0x3] }
  0x33   : > { %2958 = vmatmul.mubr.msk.bf16.gmra.mxu1 %vm509_vm3, %v3637_v37  ;;  %v371_v44 = vor.u32 %v370_v30, %v366_v13  ;;  %v378_v47 = vshrl.u32 %v3633_v34, 16  ;;  %v380_v49 = vshll.u32 %v3633_v34, 16  ;;  %v471_v53 = vrot.slane %v469_v38, 1  ;;  %v229_v30 = vld [vmem:[%s3480_s7 + $0xa8] sm:$0xff] }
  0x34   : > { %v385_v56 = vshll.u32 %v3640_v39, 16  ;;  %v3652_v57 = vpack.c.bf16 %v249_v35, %v249_v35  ;;  %v474_v60 = vshrl.u32 %v3642_v42, 16  ;;  %v467_v2 = vor.u32 %v466_v46, %v462_v29  ;;  %v253_v46 = vld [vmem:[%s3480_s7 + $0x168] sm:$0xff] }
  0x35   : > { %v3658_v1 = vsel %vm316_vm2, %v371_v44, %v375_v31  ;;  %v382_v4 = vrot.slane %v380_v49, 1  ;;  %v476_v7 = vshll.u32 %v3642_v42, 16  ;;  %v3664_v13 = vpack.c.bf16 %v227_v50, %v226_v43  ;;  %v230_v31 = vld [vmem:[%s3480_s7 + $0xb0] sm:$0xff] }
  0x36   : > { %2945 = vmatprep.mubr.msk.bf16.mxu0 %vm509_vm3, %v3658_v1  ;;  %v387_v8 = vrot.slane %v385_v56, 1  ;;  %v481_v9 = vshll.u32 %v3652_v57, 16  ;;  %v3666_v14 = vpack.c.bf16 %v228_v52, %v228_v52  ;;  %v3670_v17 = vsel %vm316_vm2, %v467_v2, %v471_v53  ;;  %v254_v49 = vld [vmem:[%s3480_s7 + $0x170] sm:$0xff] }
  0x37   : > { %v383_v20 = vor.u32 %v382_v4, %v378_v47  ;;  %v478_v26 = vrot.slane %v476_v7, 1  ;;  %v3672_v29 = vpack.c.bf16 %v251_v11, %v250_v61  ;;  %2961 = vmatprep.mubr.msk.bf16.mxu1 %vm509_vm3, %v3670_v17  ;;  %v390_v38 = vshrl.u32 %v3664_v13, 16  ;;  %v255_v4 = vld [vmem:[%s3480_s7 + $0x178] sm:$0x3] }
  0x38   : > { %v483_v35 = vrot.slane %v481_v9, 1  ;;  %v392_v43 = vshll.u32 %v3664_v13, 16  ;;  %v397_v44 = vshll.u32 %v3666_v14, 16  ;;  %v3687_v52 = vpack.c.bf16 %v252_v16, %v252_v16 }
  0x39   : > { %v3685_v47 = vsel %vm316_vm2, %v383_v20, %v387_v8  ;;  %v479_v50 = vor.u32 %v478_v26, %v474_v60  ;;  %v486_v53 = vshrl.u32 %v3672_v29, 16  ;;  %v488_v11 = vshll.u32 %v3672_v29, 16 }
  0x3a   : > { %2946 = vmatmul.mubr.msk.bf16.gmra.mxu0 %vm509_vm3, %v3685_v47  ;;  %v394_v56 = vrot.slane %v392_v43, 1  ;;  %v399_v61 = vrot.slane %v397_v44, 1  ;;  %v3693_v2 = vpack.c.bf16 %v230_v31, %v229_v30  ;;  %v493_v8 = vshll.u32 %v3687_v52, 16 }
  0x3b   : > { %v3697_v7 = vsel %vm316_vm2, %v479_v50, %v483_v35  ;;  %v3700_v60 = vpack.c.bf16 %v231_v32, %v231_v32  ;;  %v3702_v9 = vpack.c.bf16 %v254_v49, %v253_v46  ;;  %v490_v20 = vrot.slane %v488_v11, 1 }
  0x3c   : > { %4723 = vst [vmem:[#allocation5_spill] sm:$0xff] %v3697_v7  ;;  %2962 = vmatmul.mubr.msk.bf16.gmra.mxu1 %vm509_vm3, %v3697_v7  ;;  %v395_v16 = vor.u32 %v394_v56, %v390_v38  ;;  %v402_v26 = vshrl.u32 %v3693_v2, 16  ;;  %v404_v30 = vshll.u32 %v3693_v2, 16  ;;  %v495_v31 = vrot.slane %v493_v8, 1 }
  0x3d   : > { %v409_v43 = vshll.u32 %v3700_v60, 16  ;;  %v3709_v35 = vpack.c.bf16 %v255_v4, %v255_v4  ;;  %v498_v44 = vshrl.u32 %v3702_v9, 16  ;;  %v491_v46 = vor.u32 %v490_v20, %v486_v53 }
  0x3e   : > { %v3713_v32 = vsel %vm316_vm2, %v395_v16, %v399_v61  ;;  %v406_v49 = vrot.slane %v404_v30, 1  ;;  %v500_v50 = vshll.u32 %v3702_v9, 16  ;;  %v955_v11 = vrot.slane %v3490_v18, 1 }
  0x3f   : > { %2949 = vmatprep.mubr.msk.bf16.mxu0 %vm509_vm3, %v3713_v32  ;;  %v411_v38 = vrot.slane %v409_v43, 1  ;;  %v505_v56 = vshll.u32 %v3709_v35, 16  ;;  %v956_v4 = vrot.slane %v3492_v19, 1  ;;  %v3722_v8 = vsel %vm316_vm2, %v491_v46, %v495_v31  ;;  %v304_v43 = vld [vmem:[%s4716_s1 + $0x18] sm:$0x7] }
  0x40   : > { %v407_v7 = vor.u32 %v406_v49, %v402_v26  ;;  %v502_v61 = vrot.slane %v500_v50, 1  ;;  %2965 = vmatprep.mubr.msk.bf16.mxu1 %vm509_vm3, %v3722_v8  ;;  %v959_v19 = vrot.slane %v3518_v40, 1  ;;  %v958_v31 = vrot.slane %v3510_v33, 1 }
  0x41   : > { %v507_v53 = vrot.slane %v505_v56, 1  ;;  %v957_v16 = vsel %vm954_vm4, %v955_v11, %v956_v4  ;;  %v962_v46 = vrot.slane %v3535_v59, 1  ;;  %v313_v49 = vpack.c.bf16 %v304_v43, %v304_v43 }
  0x42   : > { %v3728_v20 = vsel %vm316_vm2, %v407_v7, %v411_v38  ;;  %v503_v30 = vor.u32 %v502_v61, %v498_v44  ;;  %v303_v7 = vld [vmem:[%s4716_s1 + $0x14] sm:$0x7]  ;;  %v961_v44 = vrot.slane %v3533_v58, 1  ;;  %v3751_v50 = vsel %vm954_vm4, %v958_v31, %v959_v19 }
  0x43   : > { %2950 = vmatmul.mubr.msk.bf16.gmra.mxu0 %vm509_vm3, %v3728_v20  ;;  %v312_v40 = vpack.c.bf16 %v303_v7, %v303_v7  ;;  %v3757_v56 = vand.u32 %v3461_v5, %v313_v49  ;;  %v965_v59 = vrot.slane %v3574_v36, 1  ;;  %v967_v4 = vrot.slane %v3603_v62, 1 }
  0x44   : > { %v3737_v26 = vsel %vm316_vm2, %v503_v30, %v507_v53  ;;  %3005 = vmatprep.mubr.msk.bf16.mxu0 %vm509_vm3, %v957_v16  ;;  %v3754_v38 = vsel %vm954_vm4, %v961_v44, %v962_v46  ;;  %v968_v61 = vrot.slane %v3605_v63, 1  ;;  %v970_v63 = vrot.slane %v3633_v34, 1 }
  0x45   : > { %2966 = vmatmul.mubr.msk.bf16.gmra.mxu1 %vm509_vm3, %v3737_v26  ;;  %v3762_v11 = vand.u32 %v3461_v5, %v312_v40  ;;  %v973_v53 = vrot.slane %v3664_v13, 1  ;;  %v974_v16 = vrot.slane %v3666_v14, 1  ;;  %v977_v19 = vrot.slane %v3700_v60, 1 }
  0x46   : > { %2971 = vmatprep.mubr.msk.bf16.mxu1 %vm509_vm3, %v3490_v18  ;;  %v964_v18 = vrot.slane %v3565_v22, 1  ;;  %v3782_v36 = vsel %vm954_vm4, %v967_v4, %v968_v61  ;;  %v979_v14 = vrot.slane %v3497_v23, 1  ;;  %v980_v31 = vrot.slane %v3499_v24, 1 }
  0x47   : > { %v3800_v43 = vsel %vm954_vm4, %v973_v53, %v974_v16  ;;  %v982_v60 = vrot.slane %v3529_v54, 1  ;;  %v983_v46 = vrot.slane %v3531_v55, 1  ;;  %v985_v24 = vrot.slane %v3558_v15, 1 }
  0x48   : > { %v3818_v44 = vsel %vm954_vm4, %v979_v14, %v980_v31  ;;  %v986_v49 = vrot.slane %v3563_v21, 1  ;;  %v988_v55 = vrot.slane %v3582_v41, 1  ;;  %v991_v21 = vrot.slane %v3612_v3, 1  ;;  %v306_v14 = vld [vmem:[%s4716_s1 + $0x20] sm:$0x7] }
  0x49   : > { %v3833_v40 = vsel %vm954_vm4, %v982_v60, %v983_v46  ;;  %v992_v4 = vrot.slane %v3627_v27, 1  ;;  %v997_v27 = vrot.slane %v3672_v29, 1  ;;  %v998_v53 = vrot.slane %v3687_v52, 1 }
  0x4a   : > { %v315_v31 = vpack.c.bf16 %v306_v14, %v306_v14 }
  0x4b   : > { %3006 = vmatmul.mubr.msk.bf16.vlgmr.msra.gmra.mxu0 %vm509_vm3, %v3751_v50 }
  0x4c   : > { %3072 = vmatpush3.bf16.msra.mxu0 %v3527_v51  ;;  %3009 = vmatprep.mubr.msk.bf16.mxu0 %vm509_vm3, %v3754_v38  ;;  %v3779_v51 = vsel %vm954_vm4, %v964_v18, %v965_v59  ;;  %v3836_v18 = vsel %vm954_vm4, %v985_v24, %v986_v49  ;;  %v989_v59 = vrot.slane %v3593_v48, 1  ;;  %v994_v48 = vrot.slane %v3642_v42, 1 }
  0x4d   : > { %2972 = vmatmul.mubr.msk.bf16.vlgmr.msra.gmra.mxu1 %vm509_vm3, %v3510_v33  ;;  %3139 = vmatprep.subr.bf16.mxu0 %v3757_v56  ;;  %v2278_v46 = vand.u32 %v3461_v5, %v315_v31  ;;  %v259_v31 = vld [vmem:[%s3480_s7 + $0x198] sm:$0xff] }
  0x4e   : > { %3038 = vmatpush3.bf16.msra.mxu1 %v3505_v28  ;;  %2975 = vmatprep.mubr.msk.bf16.mxu1 %vm509_vm3, %v3533_v58  ;;  %v971_v28 = vrot.slane %v3640_v39, 1  ;;  %v976_v39 = vrot.slane %v3693_v2, 1  ;;  %v3851_v61 = vsel %vm954_vm4, %v988_v55, %v989_v59 }
  0x4f   : > { %3105 = vmatprep.subr.bf16.mxu1 %v3762_v11 }
  0x50   : > { %v3797_v30 = vsel %vm954_vm4, %v970_v63, %v971_v28  ;;  %v3815_v7 = vsel %vm954_vm4, %v976_v39, %v977_v19  ;;  %v3854_v63 = vsel %vm954_vm4, %v991_v21, %v992_v4  ;;  %v995_v28 = vrot.slane %v3652_v57, 1 }
  0x51   : > { %v3872_v39 = vsel %vm954_vm4, %v997_v27, %v998_v53  ;;  %v1000_v57 = vrot.slane %v3702_v9, 1  ;;  %v1001_v19 = vrot.slane %v3709_v35, 1  ;;  %v305_v35 = vld [vmem:[%s4716_s1 + $0x1c] sm:$0x7] }
  0x52   : > { %v3869_v16 = vsel %vm954_vm4, %v994_v48, %v995_v28  ;;  %v314_v60 = vpack.c.bf16 %v305_v35, %v305_v35 }
  0x53   : > { %3010 = vmatmul.mubr.msk.bf16.gmra.mxu0 %vm509_vm3, %v3779_v51  ;;  %v3885_v52 = vsel %vm954_vm4, %v1000_v57, %v1001_v19 }
  0x54   : > { %3013 = vmatprep.mubr.msk.bf16.mxu0 %vm509_vm3, %v3782_v36  ;;  %v2074_v24 = vand.u32 %v3461_v5, %v314_v60  ;;  %v256_v5 = vld [vmem:[%s3480_s7 + $0x180] sm:$0xff] }
  0x55   : > { %2976 = vmatmul.mubr.msk.bf16.gmra.mxu1 %vm509_vm3, %v3565_v22  ;;  %v260_v60 = vld [vmem:[%s3480_s7 + $0x1a0] sm:$0xff] }
  0x56   : > { %2979 = vmatprep.mubr.msk.bf16.mxu1 %vm509_vm3, %v3603_v62 }
  0x5b   : > { %3014 = vmatmul.mubr.msk.bf16.gmra.mxu0 %vm509_vm3, %v3797_v30 }
  0x5c   : > { %3017 = vmatprep.mubr.msk.bf16.mxu0 %vm509_vm3, %v3800_v43 }
  0x5d   : > { %2980 = vmatmul.mubr.msk.bf16.gmra.mxu1 %vm509_vm3, %v3633_v34 }
  0x5e   : > { %2983 = vmatprep.mubr.msk.bf16.mxu1 %vm509_vm3, %v3664_v13 }
  0x63   : > { %3018 = vmatmul.mubr.msk.bf16.gmra.mxu0 %vm509_vm3, %v3815_v7 }
  0x64   : > { %3021 = vmatprep.mubr.msk.bf16.mxu0 %vm509_vm3, %v3818_v44 }
  0x65   : > { %2984 = vmatmul.mubr.msk.bf16.gmra.mxu1 %vm509_vm3, %v3693_v2 }
  0x66   : > { %2987 = vmatprep.mubr.msk.bf16.mxu1 %vm509_vm3, %v3497_v23 }
  0x6b   : > { %3022 = vmatmul.mubr.msk.bf16.gmra.mxu0 %vm509_vm3, %v3833_v40 }
  0x6c   : > { %3025 = vmatprep.mubr.msk.bf16.mxu0 %vm509_vm3, %v3836_v18 }
  0x6d   : > { %2988 = vmatmul.mubr.msk.bf16.gmra.mxu1 %vm509_vm3, %v3529_v54 }
  0x6e   : > { %2991 = vmatprep.mubr.msk.bf16.mxu1 %vm509_vm3, %v3558_v15 }
  0x73   : > { %3026 = vmatmul.mubr.msk.bf16.gmra.mxu0 %vm509_vm3, %v3851_v61 }
  0x74   : > { %3029 = vmatprep.mubr.msk.bf16.mxu0 %vm509_vm3, %v3854_v63 }
  0x75   : > { %2992 = vmatmul.mubr.msk.bf16.gmra.mxu1 %vm509_vm3, %v3582_v41 }
  0x76   : > { %2995 = vmatprep.mubr.msk.bf16.mxu1 %vm509_vm3, %v3612_v3 }
  0x7b   : > { %3030 = vmatmul.mubr.msk.bf16.gmra.mxu0 %vm509_vm3, %v3869_v16 }
  0x7c   : > { %3033 = vmatprep.mubr.msk.bf16.mxu0 %vm509_vm3, %v3872_v39 }
  0x7d   : > { %2996 = vmatmul.mubr.msk.bf16.gmra.mxu1 %vm509_vm3, %v3642_v42 }
  0x7e   : > { %2999 = vmatprep.mubr.msk.bf16.mxu1 %vm509_vm3, %v3672_v29 }
  0x83   : > { %3034 = vmatmul.mubr.msk.bf16.gmra.mxu0 %vm509_vm3, %v3885_v52 }
  0x84   : > { %3073 = vmatprep.mubr.msk.bf16.mxu0 %vm509_vm3, %v3555_v10 }
  0x85   : > { %3000 = vmatmul.mubr.msk.bf16.gmra.mxu1 %vm509_vm3, %v3702_v9 }
  0x86   : > { %3039 = vmatprep.mubr.msk.bf16.mxu1 %vm509_vm3, %v3510_v33  ;;  %v257_v33 = vld [vmem:[%s3480_s7 + $0x188] sm:$0xff] }
  0x87   : > { %v3947_v10 = vpack.c.bf16 %v257_v33, %v256_v5  ;;  %v4082_v33 = vpack.c.bf16 %v260_v60, %v259_v31 }
  0x89   : > { %v1448_v55 = vshll.u32 %v3947_v10, 16  ;;  %v1446_v59 = vshrl.u32 %v3947_v10, 16 }
  0x8b   : > { %3074 = vmatmul.mubr.msk.bf16.vlgmr.msra.gmra.mxu0 %vm509_vm3, %v3590_v45  ;;  %v1450_v21 = vrot.slane %v1448_v55, 1 }
  0x8c   : > { %3140 = vmatpush3.bf16.msra.mxu0 %v3757_v56  ;;  %3077 = vmatprep.mubr.msk.bf16.mxu0 %vm509_vm3, %v3625_v25  ;;  %v258_v56 = vld [vmem:[%s3480_s7 + $0x190] sm:$0x3] }
  0x8d   : > { %3040 = vmatmul.mubr.msk.bf16.vlgmr.msra.gmra.mxu1 %vm509_vm3, %v3533_v58  ;;  %3207 = vmatprep.subr.bf16.mxu0 %v2278_v46  ;;  %v3954_v49 = vpack.c.bf16 %v258_v56, %v258_v56  ;;  %v1451_v48 = vor.u32 %v1450_v21, %v1446_v59 }
  0x8e   : > { %3106 = vmatpush3.bf16.msra.mxu1 %v3762_v11  ;;  %3043 = vmatprep.mubr.msk.bf16.mxu1 %vm509_vm3, %v3565_v22  ;;  %v4724_v11 = vld [vmem:[#allocation5_spill] sm:$0xff] }
  0x8f   : > { %3173 = vmatprep.subr.bf16.mxu1 %v2074_v24  ;;  %v1453_v4 = vshll.u32 %v3954_v49, 16  ;;  %v1659_v5 = vrot.slane %v3954_v49, 1 }
  0x91   : > { %v1455_v28 = vrot.slane %v1453_v4, 1 }
  0x93   : > { %3078 = vmatmul.mubr.msk.bf16.gmra.mxu0 %vm509_vm3, %v3658_v1  ;;  %v3972_v27 = vsel %vm316_vm2, %v1451_v48, %v1455_v28 }
  0x94   : > { %3081 = vmatprep.mubr.msk.bf16.mxu0 %vm509_vm3, %v3685_v47  ;;  %4725 = vst [vmem:[#allocation5_spill] sm:$0xff] %v3972_v27 }
  0x95   : > { %3044 = vmatmul.mubr.msk.bf16.gmra.mxu1 %vm509_vm3, %v3603_v62 }
  0x96   : > { %3047 = vmatprep.mubr.msk.bf16.mxu1 %vm509_vm3, %v3633_v34 }
  0x9b   : > { %3082 = vmatmul.mubr.msk.bf16.gmra.mxu0 %vm509_vm3, %v3713_v32 }
  0x9c   : > { %3085 = vmatprep.mubr.msk.bf16.mxu0 %vm509_vm3, %v3728_v20 }
  0x9d   : > { %3048 = vmatmul.mubr.msk.bf16.gmra.mxu1 %vm509_vm3, %v3664_v13 }
  0x9e   : > { %3051 = vmatprep.mubr.msk.bf16.mxu1 %vm509_vm3, %v3693_v2 }
  0xa3   : > { %3086 = vmatmul.mubr.msk.bf16.gmra.mxu0 %vm509_vm3, %v3547_v6 }
  0xa4   : > { %3089 = vmatprep.mubr.msk.bf16.mxu0 %vm509_vm3, %v3579_v12 }
  0xa5   : > { %3052 = vmatmul.mubr.msk.bf16.gmra.mxu1 %vm509_vm3, %v3497_v23 }
  0xa6   : > { %3055 = vmatprep.mubr.msk.bf16.mxu1 %vm509_vm3, %v3529_v54 }
  0xab   : > { %3090 = vmatmul.mubr.msk.bf16.gmra.mxu0 %vm509_vm3, %v3610_v0 }
  0xac   : > { %3093 = vmatprep.mubr.msk.bf16.mxu0 %vm509_vm3, %v3637_v37 }
  0xad   : > { %3056 = vmatmul.mubr.msk.bf16.gmra.mxu1 %vm509_vm3, %v3558_v15 }
  0xae   : > { %3059 = vmatprep.mubr.msk.bf16.mxu1 %vm509_vm3, %v3582_v41 }
  0xb3   : > { %3094 = vmatmul.mubr.msk.bf16.gmra.mxu0 %vm509_vm3, %v3670_v17 }
  0xb4   : > { %3097 = vmatprep.mubr.msk.bf16.mxu0 %vm509_vm3, %v4724_v11 }
  0xb5   : > { %3060 = vmatmul.mubr.msk.bf16.gmra.mxu1 %vm509_vm3, %v3612_v3 }
  0xb6   : > { %3063 = vmatprep.mubr.msk.bf16.mxu1 %vm509_vm3, %v3642_v42 }
  0xbb   : > { %3098 = vmatmul.mubr.msk.bf16.gmra.mxu0 %vm509_vm3, %v3722_v8 }
  0xbc   : > { %3101 = vmatprep.mubr.msk.bf16.mxu0 %vm509_vm3, %v3737_v26 }
  0xbd   : > { %3064 = vmatmul.mubr.msk.bf16.gmra.mxu1 %vm509_vm3, %v3672_v29 }
  0xbe   : > { %3067 = vmatprep.mubr.msk.bf16.mxu1 %vm509_vm3, %v3702_v9 }
  0xc3   : > { %3102 = vmatmul.mubr.msk.bf16.gmra.mxu0 %vm509_vm3, %v3972_v27 }
  0xc4   : > { %3141 = vmatprep.mubr.msk.bf16.mxu0 %vm509_vm3, %v3533_v58 }
  0xc5   : > { %3068 = vmatmul.mubr.msk.bf16.gmra.mxu1 %vm509_vm3, %v3947_v10 }
  0xc6   : > { %3107 = vmatprep.mubr.msk.bf16.mxu1 %vm509_vm3, %v3751_v50 }
  0xcb   : > { %3142 = vmatmul.mubr.msk.bf16.vlgmr.msra.gmra.mxu0 %vm509_vm3, %v3565_v22 }
  0xcc   : > { %3208 = vmatpush3.bf16.msra.mxu0 %v2278_v46  ;;  %3145 = vmatprep.mubr.msk.bf16.mxu0 %vm509_vm3, %v3603_v62 }
  0xcd   : > { %3108 = vmatmul.mubr.msk.bf16.vlgmr.msra.gmra.mxu1 %vm509_vm3, %v3754_v38 }
  0xce   : > { %3174 = vmatpush3.bf16.msra.mxu1 %v2074_v24  ;;  %3111 = vmatprep.mubr.msk.bf16.mxu1 %vm509_vm3, %v3779_v51 }
  0xd3   : > { %3146 = vmatmul.mubr.msk.bf16.gmra.mxu0 %vm509_vm3, %v3633_v34 }
  0xd4   : > { %3149 = vmatprep.mubr.msk.bf16.mxu0 %vm509_vm3, %v3664_v13 }
  0xd5   : > { %3112 = vmatmul.mubr.msk.bf16.gmra.mxu1 %vm509_vm3, %v3782_v36 }
  0xd6   : > { %3115 = vmatprep.mubr.msk.bf16.mxu1 %vm509_vm3, %v3797_v30 }
  0xdb   : > { %3150 = vmatmul.mubr.msk.bf16.gmra.mxu0 %vm509_vm3, %v3693_v2 }
  0xdc   : > { %3153 = vmatprep.mubr.msk.bf16.mxu0 %vm509_vm3, %v3497_v23 }
  0xdd   : > { %3116 = vmatmul.mubr.msk.bf16.gmra.mxu1 %vm509_vm3, %v3800_v43 }
  0xde   : > { %3119 = vmatprep.mubr.msk.bf16.mxu1 %vm509_vm3, %v3815_v7 }
  0xe3   : > { %3154 = vmatmul.mubr.msk.bf16.gmra.mxu0 %vm509_vm3, %v3529_v54 }
  0xe4   : > { %3157 = vmatprep.mubr.msk.bf16.mxu0 %vm509_vm3, %v3558_v15 }
  0xe5   : > { %3120 = vmatmul.mubr.msk.bf16.gmra.mxu1 %vm509_vm3, %v3818_v44 }
  0xe6   : > { %3123 = vmatprep.mubr.msk.bf16.mxu1 %vm509_vm3, %v3833_v40 }
  0xe7   : > { %v2939_v58 = vpop.f32.mrf.mxu0 }
  0xe9   : > { %v4014_v23 = vpop.f32.mrf.mxu0 }
  0xeb   : > { %v4016_v22 = vpop.f32.mrf.mxu1  ;;  %3158 = vmatmul.mubr.msk.bf16.gmra.mxu0 %vm509_vm3, %v3582_v41  ;;  %v4020_v62 = vpop.f32.mrf.mxu0 }
  0xec   : > { %3161 = vmatprep.mubr.msk.bf16.mxu0 %vm509_vm3, %v3612_v3 }
  0xed   : > { %3124 = vmatmul.mubr.msk.bf16.gmra.mxu1 %vm509_vm3, %v3836_v18  ;;  %v4026_v54 = vpop.f32.mrf.mxu1  ;;  %v4028_v15 = vpop.f32.mrf.mxu0 }
  0xee   : > { %3127 = vmatprep.mubr.msk.bf16.mxu1 %vm509_vm3, %v3851_v61 }
  0xef   : > { %v4032_v34 = vpop.f32.mrf.mxu1 }
  0xf1   : > { %v4034_v13 = vpop.f32.mrf.mxu1  ;;  %v4036_v41 = vpop.f32.mrf.mxu0 }
  0xf3   : > { %v4038_v2 = vpop.f32.mrf.mxu1  ;;  %3162 = vmatmul.mubr.msk.bf16.gmra.mxu0 %vm509_vm3, %v3642_v42  ;;  %v4042_v3 = vpop.f32.mrf.mxu0 }
  0xf4   : > { %3165 = vmatprep.mubr.msk.bf16.mxu0 %vm509_vm3, %v3672_v29 }
  0xf5   : > { %3128 = vmatmul.mubr.msk.bf16.gmra.mxu1 %vm509_vm3, %v3854_v63  ;;  %v4048_v50 = vpop.f32.mrf.mxu1  ;;  %v4050_v53 = vpop.f32.mrf.mxu0 }
  0xf6   : > { %3131 = vmatprep.mubr.msk.bf16.mxu1 %vm509_vm3, %v3869_v16 }
  0xf7   : > { %v4054_v57 = vpop.f32.mrf.mxu1  ;;  %v4056_v19 = vpop.f32.mrf.mxu0 }
  0xf9   : > { %v4058_v42 = vpop.f32.mrf.mxu1 }
  0xfa   : > { %v4060_v14 = vpop.f32.mrf.mxu0 }
  0xfb   : > { %3166 = vmatmul.mubr.msk.bf16.gmra.mxu0 %vm509_vm3, %v3702_v9  ;;  %v1658_v9 = vrot.slane %v3947_v10, 1 }
  0xfc   : > { %v4064_v29 = vpop.f32.mrf.mxu1  ;;  %v4066_v35 = vpop.f32.mrf.mxu0  ;;  %3169 = vmatprep.mubr.msk.bf16.mxu0 %vm509_vm3, %v3947_v10 }
  0xfd   : > { %4726 = vst [vmem:[#allocation6_spill] sm:$0xff] %v4064_v29  ;;  %3132 = vmatmul.mubr.msk.bf16.gmra.mxu1 %vm509_vm3, %v3872_v39  ;;  %v4091_v21 = vsel %vm954_vm4, %v1658_v9, %v1659_v5 }
  0xfe   : > { %v4074_v46 = vpop.f32.mrf.mxu1  ;;  %v4076_v24 = vpop.f32.mrf.mxu0  ;;  %3135 = vmatprep.mubr.msk.bf16.mxu1 %vm509_vm3, %v3885_v52 }
  0xff   : > { %4727 = vst [vmem:[#allocation7_spill] sm:$0xff] %v4074_v46 }
 0x100   : > { %v4084_v56 = vpop.f32.mrf.mxu1  ;;  %v4086_v55 = vpop.f32.mrf.mxu0 }
 0x101   : > { %4728 = vst [vmem:[#allocation8_spill] sm:$0xff] %v4084_v56 }
 0x102   : > { %v4088_v59 = vpop.f32.mrf.mxu1 }
 0x103   : > { %4729 = vst [vmem:[#allocation9_spill] sm:$0xff] %v4088_v59  ;;  %v4093_v4 = vpop.f32.mrf.mxu0  ;;  %3170 = vmatmul.mubr.msk.bf16.gmra.mxu0 %vm509_vm3, %v4082_v33 }
 0x104   : > { %3209 = vmatprep.mubr.msk.bf16.mxu0 %vm509_vm3, %v3754_v38 }
 0x105   : > { %v4099_v10 = vpop.f32.mrf.mxu1  ;;  %3136 = vmatmul.mubr.msk.bf16.gmra.mxu1 %vm509_vm3, %v4091_v21  ;;  %v4103_v49 = vpop.f32.mrf.mxu0 }
 0x106   : > { %4730 = vst [vmem:[#allocation10_spill] sm:$0xff] %v4099_v10  ;;  %3175 = vmatprep.mubr.msk.bf16.mxu1 %vm509_vm3, %v3590_v45 }
 0x107   : > { %v4107_v48 = vpop.f32.mrf.mxu1  ;;  %v4109_v28 = vpop.f32.mrf.mxu0 }
 0x108   : > { %4731 = vst [vmem:[#allocation11_spill] sm:$0xff] %v4107_v48 }
 0x109   : > { %v4111_v31 = vpop.f32.mrf.mxu1  ;;  %v4113_v60 = vpop.f32.mrf.mxu0 }
 0x10a   : > { %4732 = vst [vmem:[#allocation12_spill] sm:$0xff] %v4111_v31 }
 0x10b   : > { %v4115_v9 = vpop.f32.mrf.mxu1  ;;  %v3007_v38 = vpop.f32.mrf.mxu0  ;;  %3210 = vmatmul.mubr.msk.bf16.vlgmr.msra.gmra.mxu0 %vm509_vm3, %v3779_v51 }
 0x10c   : > { %4733 = vst [vmem:[#allocation13_spill] sm:$0xff] %v4115_v9  ;;  %3213 = vmatprep.mubr.msk.bf16.mxu0 %vm509_vm3, %v3782_v36 }
 0x10d   : > { %v2973_v5 = vpop.f32.mrf.mxu1  ;;  %3176 = vmatmul.mubr.msk.bf16.vlgmr.msra.gmra.mxu1 %vm509_vm3, %v3625_v25  ;;  %v1088_v45 = vpop.f32.mrf.mxu0 }
 0x10e   : > { %v804_v48 = vadd.f32 %v2973_v5, %v2939_v58  ;;  %3179 = vmatprep.mubr.msk.bf16.mxu1 %vm509_vm3, %v3658_v1 }
 0x10f   : > { %v795_v31 = vpop.f32.mrf.mxu1  ;;  %v3008_v10 = vpop.f32.mrf.mxu0 }
 0x110   : > { %v4125_v59 = vadd.f32 %v3007_v38, %v804_v48  ;;  %v796_v9 = vadd.f32 %v795_v31, %v4014_v23 }
 0x111   : > { %v2974_v56 = vpop.f32.mrf.mxu1  ;;  %v1091_v51 = vpop.f32.mrf.mxu0 }
 0x112   : > { %v4128_v46 = vadd.f32 %v1088_v45, %v796_v9  ;;  %v807_v36 = vadd.f32 %v2974_v56, %v4020_v62 }
 0x113   : > { %v798_v27 = vpop.f32.mrf.mxu1  ;;  %v3011_v29 = vpop.f32.mrf.mxu0  ;;  %3214 = vmatmul.mubr.msk.bf16.gmra.mxu0 %vm509_vm3, %v3797_v30 }
 0x114   : > { %v4133_v25 = vadd.f32 %v3008_v10, %v807_v36  ;;  %v799_v1 = vadd.f32 %v798_v27, %v4028_v15  ;;  %3217 = vmatprep.mubr.msk.bf16.mxu0 %vm509_vm3, %v3800_v43 }
 0x115   : > { %v2977_v58 = vpop.f32.mrf.mxu1  ;;  %3180 = vmatmul.mubr.msk.bf16.gmra.mxu1 %vm509_vm3, %v3685_v47  ;;  %v1104_v23 = vpop.f32.mrf.mxu0 }
 0x116   : > { %v4140_v48 = vadd.f32 %v1091_v51, %v799_v1  ;;  %v820_v62 = vadd.f32 %v2977_v58, %v4036_v41  ;;  %3183 = vmatprep.mubr.msk.bf16.mxu1 %vm509_vm3, %v3713_v32 }
 0x117   : > { %v811_v30 = vpop.f32.mrf.mxu1  ;;  %v3012_v56 = vpop.f32.mrf.mxu0 }
 0x118   : > { %v4145_v10 = vadd.f32 %v3011_v29, %v820_v62  ;;  %v812_v27 = vadd.f32 %v811_v30, %v4042_v3 }
 0x119   : > { %v2978_v15 = vpop.f32.mrf.mxu1  ;;  %v1107_v43 = vpop.f32.mrf.mxu0 }
 0x11a   : > { %v4148_v31 = vadd.f32 %v1104_v23, %v812_v27  ;;  %v823_v47 = vadd.f32 %v2978_v15, %v4050_v53 }
 0x11b   : > { %v814_v9 = vpop.f32.mrf.mxu1  ;;  %v3015_v38 = vpop.f32.mrf.mxu0  ;;  %3218 = vmatmul.mubr.msk.bf16.gmra.mxu0 %vm509_vm3, %v3815_v7 }
 0x11c   : > { %v4153_v41 = vadd.f32 %v3012_v56, %v823_v47  ;;  %v815_v32 = vadd.f32 %v814_v9, %v4056_v19  ;;  %3221 = vmatprep.mubr.msk.bf16.mxu0 %vm509_vm3, %v3818_v44 }
 0x11d   : > { %v2981_v29 = vpop.f32.mrf.mxu1  ;;  %3184 = vmatmul.mubr.msk.bf16.gmra.mxu1 %vm509_vm3, %v3728_v20  ;;  %v1120_v3 = vpop.f32.mrf.mxu0 }
 0x11e   : > { %v4160_v5 = vadd.f32 %v1107_v43, %v815_v32  ;;  %v836_v53 = vadd.f32 %v2981_v29, %v4060_v14  ;;  %3187 = vmatprep.mubr.msk.bf16.mxu1 %vm509_vm3, %v3547_v6 }
 0x11f   : > { %v827_v7 = vpop.f32.mrf.mxu1  ;;  %v3016_v45 = vpop.f32.mrf.mxu0 }
 0x120   : > { %v4165_v51 = vadd.f32 %v3015_v38, %v836_v53  ;;  %v828_v19 = vadd.f32 %v827_v7, %v4066_v35 }
 0x121   : > { %v2982_v36 = vpop.f32.mrf.mxu1  ;;  %v1123_v44 = vpop.f32.mrf.mxu0 }
 0x122   : > { %v4168_v1 = vadd.f32 %v1120_v3, %v828_v19  ;;  %v839_v20 = vadd.f32 %v2982_v36, %v4076_v24 }
 0x123   : > { %v830_v58 = vpop.f32.mrf.mxu1  ;;  %v3019_v23 = vpop.f32.mrf.mxu0  ;;  %3222 = vmatmul.mubr.msk.bf16.gmra.mxu0 %vm509_vm3, %v3833_v40 }
 0x124   : > { %v4173_v14 = vadd.f32 %v3016_v45, %v839_v20  ;;  %v831_v6 = vadd.f32 %v830_v58, %v4086_v55  ;;  %3225 = vmatprep.mubr.msk.bf16.mxu0 %vm509_vm3, %v3836_v18  ;;  %v2061_v58 = vshll.u32 %v4082_v33, 16 }
 0x125   : > { %v2985_v62 = vpop.f32.mrf.mxu1  ;;  %3188 = vmatmul.mubr.msk.bf16.gmra.mxu1 %vm509_vm3, %v3579_v12  ;;  %v1136_v35 = vpop.f32.mrf.mxu0 }
 0x126   : > { %v4180_v30 = vadd.f32 %v1123_v44, %v831_v6  ;;  %v852_v24 = vadd.f32 %v2985_v62, %v4093_v4  ;;  %3191 = vmatprep.mubr.msk.bf16.mxu1 %vm509_vm3, %v3610_v0 }
 0x127   : > { %v843_v40 = vpop.f32.mrf.mxu1  ;;  %v3020_v56 = vpop.f32.mrf.mxu0 }
 0x128   : > { %v4185_v27 = vadd.f32 %v3019_v23, %v852_v24  ;;  %v844_v55 = vadd.f32 %v843_v40, %v4103_v49  ;;  %v2063_v40 = vrot.slane %v2061_v58, 1 }
 0x129   : > { %v2986_v15 = vpop.f32.mrf.mxu1  ;;  %v1139_v18 = vpop.f32.mrf.mxu0 }
 0x12a   : > { %v4188_v43 = vadd.f32 %v1136_v35, %v844_v55  ;;  %v855_v12 = vadd.f32 %v2986_v15, %v4109_v28 }
 0x12b   : > { %v846_v47 = vpop.f32.mrf.mxu1  ;;  %v3023_v9 = vpop.f32.mrf.mxu0  ;;  %3226 = vmatmul.mubr.msk.bf16.gmra.mxu0 %vm509_vm3, %v3851_v61 }
 0x12c   : > { %v4193_v4 = vadd.f32 %v3020_v56, %v855_v12  ;;  %v847_v0 = vadd.f32 %v846_v47, %v4113_v60  ;;  %3229 = vmatprep.mubr.msk.bf16.mxu0 %vm509_vm3, %v3854_v63 }
 0x12d   : > { %v2989_v38 = vpop.f32.mrf.mxu1  ;;  %3192 = vmatmul.mubr.msk.bf16.gmra.mxu1 %vm509_vm3, %v3637_v37  ;;  %v1152_v49 = vpop.f32.mrf.mxu0 }
 0x12e   : > { %v4200_v32 = vadd.f32 %v1139_v18, %v847_v0  ;;  %v868_v28 = vadd.f32 %v2989_v38, %v4016_v22  ;;  %3195 = vmatprep.mubr.msk.bf16.mxu1 %vm509_vm3, %v3670_v17  ;;  %v261_v22 = vld [vmem:[%s3480_s7 + $0x1a8] sm:$0x3]  ;;  %s4660_s7 = scalar_lea.hbm %s4717_s2, %s2781_s3 }
 0x12f   : > { %v859_v61 = vpop.f32.mrf.mxu1  ;;  %v3024_v29 = vpop.f32.mrf.mxu0  ;;  %v4734_v0 = vld [vmem:[#allocation6_spill] sm:$0xff] }
 0x130   : > { %v4205_v3 = vadd.f32 %v3023_v9, %v868_v28  ;;  %v860_v60 = vadd.f32 %v859_v61, %v4026_v54 }
 0x131   : > { %v2990_v63 = vpop.f32.mrf.mxu1  ;;  %v1155_v53 = vpop.f32.mrf.mxu0 }
 0x132   : > { %v4208_v7 = vadd.f32 %v1152_v49, %v860_v60  ;;  %v871_v37 = vadd.f32 %v2990_v63, %v4032_v34 }
 0x133   : > { %v862_v45 = vpop.f32.mrf.mxu1  ;;  %v3027_v19 = vpop.f32.mrf.mxu0  ;;  %3230 = vmatmul.mubr.msk.bf16.gmra.mxu0 %vm509_vm3, %v3869_v16  ;;  %v297_v16 = vpack.c.bf16 %v261_v22, %v261_v22 }
 0x134   : > { %v4214_v36 = vadd.f32 %v3024_v29, %v871_v37  ;;  %v863_v17 = vadd.f32 %v862_v45, %v4034_v13  ;;  %3233 = vmatprep.mubr.msk.bf16.mxu0 %vm509_vm3, %v3872_v39  ;;  %v4737_v37 = vld [vmem:[#allocation8_spill] sm:$0xff] }
 0x135   : > { %v2993_v54 = vpop.f32.mrf.mxu1  ;;  %3196 = vmatmul.mubr.msk.bf16.gmra.mxu1 %vm509_vm3, %v4724_v11  ;;  %v1168_v44 = vpop.f32.mrf.mxu0  ;;  %v2059_v11 = vshrl.u32 %v4082_v33, 16  ;;  %v2066_v56 = vshll.u32 %v297_v16, 16  ;;  %v2272_v12 = vrot.slane %v297_v16, 1 }
 0x136   : > { %v4221_v20 = vadd.f32 %v1155_v53, %v863_v17  ;;  %v884_v34 = vadd.f32 %v2993_v54, %v4038_v2  ;;  %3199 = vmatprep.mubr.msk.bf16.mxu1 %vm509_vm3, %v3722_v8 }
 0x137   : > { %v875_v23 = vpop.f32.mrf.mxu1  ;;  %v3028_v13 = vpop.f32.mrf.mxu0  ;;  %v2064_v49 = vor.u32 %v2063_v40, %v2059_v11 }
 0x138   : > { %v4227_v6 = vadd.f32 %v3027_v19, %v884_v34  ;;  %v876_v39 = vadd.f32 %v875_v23, %v4048_v50  ;;  %v2271_v50 = vrot.slane %v4082_v33, 1  ;;  %v4736_v33 = vld [vmem:[#allocation7_spill] sm:$0xff] }
 0x139   : > { %v2994_v62 = vpop.f32.mrf.mxu1  ;;  %v1171_v35 = vpop.f32.mrf.mxu0 }
 0x13a   : > { %v4231_v24 = vadd.f32 %v1168_v44, %v876_v39  ;;  %v887_v2 = vadd.f32 %v2994_v62, %v4054_v57  ;;  %v2273_v60 = vsel %vm954_vm4, %v2271_v50, %v2272_v12  ;;  %v4738_v44 = vld [vmem:[#allocation9_spill] sm:$0xff] }
 0x13b   : > { %v878_v8 = vpop.f32.mrf.mxu1  ;;  %v3031_v55 = vpop.f32.mrf.mxu0  ;;  %3234 = vmatmul.mubr.msk.bf16.gmra.mxu0 %vm509_vm3, %v3885_v52  ;;  %v4735_v52 = vld [vmem:[#allocation5_spill] sm:$0xff] }
 0x13c   : > { %v4236_v15 = vadd.f32 %v3028_v13, %v887_v2  ;;  %v879_v18 = vadd.f32 %v878_v8, %v4058_v42  ;;  %3237 = vmatprep.mubr.msk.bf16.mxu0 %vm509_vm3, %v4091_v21  ;;  %v2068_v42 = vrot.slane %v2066_v56, 1  ;;  %v4739_v13 = vld [vmem:[#allocation10_spill] sm:$0xff]  ;;  %v4740_v2 = vld [vmem:[#allocation11_spill] sm:$0xff] }
 0x13d   : > { %v2997_v47 = vpop.f32.mrf.mxu1  ;;  %3200 = vmatmul.mubr.msk.bf16.gmra.mxu1 %vm509_vm3, %v3737_v26  ;;  %v1184_v57 = vpop.f32.mrf.mxu0 }
 0x13e   : > { %v4244_v9 = vadd.f32 %v1171_v35, %v879_v18  ;;  %v900_v38 = vadd.f32 %v2997_v47, %v4734_v0  ;;  %3203 = vmatprep.mubr.msk.bf16.mxu1 %vm509_vm3, %v4735_v52  ;;  %v2069_v19 = vsel %vm316_vm2, %v2064_v49, %v2068_v42  ;;  %v4741_v18 = vld [vmem:[#allocation12_spill] sm:$0xff]  ;;  %v4742_v0 = vld [vmem:[#allocation13_spill] sm:$0xff] }
 0x13f   : > { %v891_v28 = vpop.f32.mrf.mxu1  ;;  %v3032_v61 = vpop.f32.mrf.mxu0 }
 0x140   : > { %v4249_v21 = vadd.f32 %v3031_v55, %v900_v38  ;;  %v892_v29 = vadd.f32 %v891_v28, %v4736_v33 }
 0x141   : > { %v2998_v63 = vpop.f32.mrf.mxu1  ;;  %v1187_v26 = vpop.f32.mrf.mxu0 }
 0x142   : > { %v4253_v53 = vadd.f32 %v1184_v57, %v892_v29  ;;  %v903_v45 = vadd.f32 %v2998_v63, %v4737_v37 }
 0x143   : > { %v894_v22 = vpop.f32.mrf.mxu1  ;;  %v3035_v17 = vpop.f32.mrf.mxu0  ;;  %3238 = vmatmul.mubr.msk.bf16.gmra.mxu0 %vm509_vm3, %v2273_v60 }
 0x144   : > { %v4258_v54 = vadd.f32 %v3032_v61, %v903_v45  ;;  %v895_v34 = vadd.f32 %v894_v22, %v4738_v44 }
 0x145   : > { %v3001_v16 = vpop.f32.mrf.mxu1  ;;  %3204 = vmatmul.mubr.msk.bf16.gmra.mxu1 %vm509_vm3, %v2069_v19  ;;  %v1200_v58 = vpop.f32.mrf.mxu0 }
 0x146   : > { %v4262_v23 = vadd.f32 %v1187_v26, %v895_v34  ;;  %v916_v39 = vadd.f32 %v3001_v16, %v4739_v13 }
 0x147   : > { %v907_v62 = vpop.f32.mrf.mxu1  ;;  %v3036_v35 = vpop.f32.mrf.mxu0 }
 0x148   : > { %v4265_v11 = vadd.f32 %v3035_v17, %v916_v39  ;;  %v908_v40 = vadd.f32 %v907_v62, %v4740_v2 }
 0x149   : > { %v3002_v56 = vpop.f32.mrf.mxu1  ;;  %v1203_v8 = vpop.f32.mrf.mxu0 }
 0x14a   : > { %v4268_v55 = vadd.f32 %v1200_v58, %v908_v40  ;;  %v919_v50 = vadd.f32 %v3002_v56, %v4741_v18 }
 0x14b   : > { %v910_v12 = vpop.f32.mrf.mxu1  ;;  %v3075_v47 = vpop.f32.mrf.mxu0 }
 0x14c   : > { %v4271_v57 = vadd.f32 %v3036_v35, %v919_v50  ;;  %v911_v38 = vadd.f32 %v910_v12, %v4742_v0 }
 0x14d   : > { %v3041_v52 = vpop.f32.mrf.mxu1  ;;  %v1497_v49 = vpop.f32.mrf.mxu0 }
 0x14e   : > { %v4274_v42 = vadd.f32 %v1203_v8, %v911_v38  ;;  %v1416_v28 = vadd.f32 %v3041_v52, %v4125_v59 }
 0x14f   : > { %v1287_v61 = vpop.f32.mrf.mxu1  ;;  %v3076_v33 = vpop.f32.mrf.mxu0 }
 0x150   : > { %v4277_v29 = vadd.f32 %v3075_v47, %v1416_v28  ;;  %v1414_v60 = vadd.f32 %v1287_v61, %v4128_v46 }
 0x151   : > { %v3042_v63 = vpop.f32.mrf.mxu1  ;;  %v1500_v26 = vpop.f32.mrf.mxu0 }
 0x152   : > { %v4280_v37 = vadd.f32 %v1497_v49, %v1414_v60  ;;  %v1417_v45 = vadd.f32 %v3042_v63, %v4133_v25 }
 0x153   : > { %v1290_v19 = vpop.f32.mrf.mxu1  ;;  %v3079_v22 = vpop.f32.mrf.mxu0 }
 0x154   : > { %v4283_v17 = vadd.f32 %v3076_v33, %v1417_v45  ;;  %v1415_v44 = vadd.f32 %v1290_v19, %v4140_v48 }
 0x155   : > { %v3045_v34 = vpop.f32.mrf.mxu1  ;;  %v1513_v59 = vpop.f32.mrf.mxu0 }
 0x156   : > { %v4286_v16 = vadd.f32 %v1500_v26, %v1415_v44  ;;  %v1420_v58 = vadd.f32 %v3045_v34, %v4145_v10 }
 0x157   : > { %v1303_v13 = vpop.f32.mrf.mxu1  ;;  %v3080_v46 = vpop.f32.mrf.mxu0 }
 0x158   : > { %v4289_v39 = vadd.f32 %v3079_v22, %v1420_v58  ;;  %v1418_v62 = vadd.f32 %v1303_v13, %v4148_v31 }
 0x159   : > { %v3046_v35 = vpop.f32.mrf.mxu1  ;;  %v1516_v25 = vpop.f32.mrf.mxu0 }
 0x15a   : > { %v4292_v2 = vadd.f32 %v1513_v59, %v1418_v62  ;;  %v1421_v40 = vadd.f32 %v3046_v35, %v4153_v41 }
 0x15b   : > { %v1306_v56 = vpop.f32.mrf.mxu1  ;;  %v3083_v48 = vpop.f32.mrf.mxu0 }
 0x15c   : > { %v4295_v8 = vadd.f32 %v3080_v46, %v1421_v40  ;;  %v1419_v18 = vadd.f32 %v1306_v56, %v4160_v5 }
 0x15d   : > { %v3049_v50 = vpop.f32.mrf.mxu1  ;;  %v1529_v10 = vpop.f32.mrf.mxu0 }
 0x15e   : > { %v4298_v12 = vadd.f32 %v1516_v25, %v1419_v18  ;;  %v1424_v47 = vadd.f32 %v3049_v50, %v4165_v51 }
 0x15f   : > { %v1319_v0 = vpop.f32.mrf.mxu1  ;;  %v3084_v31 = vpop.f32.mrf.mxu0 }
 0x160   : > { %v4301_v38 = vadd.f32 %v3083_v48, %v1424_v47  ;;  %v1422_v52 = vadd.f32 %v1319_v0, %v4168_v1 }
 0x161   : > { %v3050_v49 = vpop.f32.mrf.mxu1  ;;  %v1532_v41 = vpop.f32.mrf.mxu0 }
 0x162   : > { %v4304_v28 = vadd.f32 %v1529_v10, %v1422_v52  ;;  %v1425_v61 = vadd.f32 %v3050_v49, %v4173_v14 }
 0x163   : > { %v1322_v33 = vpop.f32.mrf.mxu1  ;;  %v3087_v5 = vpop.f32.mrf.mxu0 }
 0x164   : > { %v4307_v60 = vadd.f32 %v3084_v31, %v1425_v61  ;;  %v1423_v63 = vadd.f32 %v1322_v33, %v4180_v30 }
 0x165   : > { %v3053_v26 = vpop.f32.mrf.mxu1  ;;  %v1545_v51 = vpop.f32.mrf.mxu0 }
 0x166   : > { %v4310_v45 = vadd.f32 %v1532_v41, %v1423_v63  ;;  %v1428_v19 = vadd.f32 %v3053_v26, %v4185_v27 }
 0x167   : > { %v1335_v22 = vpop.f32.mrf.mxu1  ;;  %v3088_v1 = vpop.f32.mrf.mxu0 }
 0x168   : > { %v4313_v44 = vadd.f32 %v3087_v5, %v1428_v19  ;;  %v1426_v34 = vadd.f32 %v1335_v22, %v4188_v43 }
 0x169   : > { %v3054_v59 = vpop.f32.mrf.mxu1  ;;  %v1548_v14 = vpop.f32.mrf.mxu0 }
 0x16a   : > { %v4316_v58 = vadd.f32 %v1545_v51, %v1426_v34  ;;  %v1429_v13 = vadd.f32 %v3054_v59, %v4193_v4 }
 0x16b   : > { %v1338_v46 = vpop.f32.mrf.mxu1  ;;  %v3091_v30 = vpop.f32.mrf.mxu0 }
 0x16c   : > { %v4319_v62 = vadd.f32 %v3088_v1, %v1429_v13  ;;  %v1427_v35 = vadd.f32 %v1338_v46, %v4200_v32 }
 0x16d   : > { %v3057_v25 = vpop.f32.mrf.mxu1  ;;  %v1561_v27 = vpop.f32.mrf.mxu0 }
 0x16e   : > { %v4322_v40 = vadd.f32 %v1548_v14, %v1427_v35  ;;  %v1432_v56 = vadd.f32 %v3057_v25, %v4205_v3 }
 0x16f   : > { %v1351_v48 = vpop.f32.mrf.mxu1  ;;  %v3092_v43 = vpop.f32.mrf.mxu0 }
 0x170   : > { %v4325_v18 = vadd.f32 %v3091_v30, %v1432_v56  ;;  %v1430_v50 = vadd.f32 %v1351_v48, %v4208_v7 }
 0x171   : > { %v3058_v10 = vpop.f32.mrf.mxu1  ;;  %v1564_v4 = vpop.f32.mrf.mxu0 }
 0x172   : > { %v4328_v47 = vadd.f32 %v1561_v27, %v1430_v50  ;;  %v1433_v0 = vadd.f32 %v3058_v10, %v4214_v36 }
 0x173   : > { %v1354_v31 = vpop.f32.mrf.mxu1  ;;  %v3095_v32 = vpop.f32.mrf.mxu0 }
 0x174   : > { %v4331_v52 = vadd.f32 %v3092_v43, %v1433_v0  ;;  %v1431_v49 = vadd.f32 %v1354_v31, %v4221_v20 }
 0x175   : > { %v3061_v41 = vpop.f32.mrf.mxu1  ;;  %v1577_v3 = vpop.f32.mrf.mxu0 }
 0x176   : > { %4743 = vst [vmem:[#allocation6_spill] sm:$0xff] %v4331_v52  ;;  %v4334_v61 = vadd.f32 %v1564_v4, %v1431_v49  ;;  %v1436_v33 = vadd.f32 %v3061_v41, %v4227_v6 }
 0x177   : > { %v1367_v5 = vpop.f32.mrf.mxu1  ;;  %v3096_v7 = vpop.f32.mrf.mxu0 }
 0x178   : > { %4744 = vst [vmem:[#allocation5_spill] sm:$0xff] %v4334_v61  ;;  %v4337_v63 = vadd.f32 %v3095_v32, %v1436_v33  ;;  %v1434_v26 = vadd.f32 %v1367_v5, %v4231_v24 }
 0x179   : > { %v3062_v51 = vpop.f32.mrf.mxu1  ;;  %v1580_v36 = vpop.f32.mrf.mxu0 }
 0x17a   : > { %4745 = vst [vmem:[#allocation7_spill] sm:$0xff] %v4337_v63  ;;  %v4340_v19 = vadd.f32 %v1577_v3, %v1434_v26  ;;  %v1437_v22 = vadd.f32 %v3062_v51, %v4236_v15 }
 0x17b   : > { %v1370_v1 = vpop.f32.mrf.mxu1  ;;  %v3099_v20 = vpop.f32.mrf.mxu0 }
 0x17c   : > { %4746 = vst [vmem:[#allocation8_spill] sm:$0xff] %v4340_v19  ;;  %v4343_v34 = vadd.f32 %v3096_v7, %v1437_v22  ;;  %v1435_v59 = vadd.f32 %v1370_v1, %v4244_v9 }
 0x17d   : > { %v3065_v14 = vpop.f32.mrf.mxu1  ;;  %v1593_v6 = vpop.f32.mrf.mxu0 }
 0x17e   : > { %4747 = vst [vmem:[#allocation9_spill] sm:$0xff] %v4343_v34  ;;  %v4346_v13 = vadd.f32 %v1580_v36, %v1435_v59  ;;  %v1440_v46 = vadd.f32 %v3065_v14, %v4249_v21 }
 0x17f   : > { %v1383_v30 = vpop.f32.mrf.mxu1  ;;  %v3100_v24 = vpop.f32.mrf.mxu0 }
 0x180   : > { %4748 = vst [vmem:[#allocation10_spill] sm:$0xff] %v4346_v13  ;;  %v4349_v35 = vadd.f32 %v3099_v20, %v1440_v46  ;;  %v1438_v25 = vadd.f32 %v1383_v30, %v4253_v53 }
 0x181   : > { %v3066_v27 = vpop.f32.mrf.mxu1  ;;  %v1596_v15 = vpop.f32.mrf.mxu0 }
 0x182   : > { %4749 = vst [vmem:[#allocation11_spill] sm:$0xff] %v4349_v35  ;;  %v4352_v56 = vadd.f32 %v1593_v6, %v1438_v25  ;;  %v1441_v48 = vadd.f32 %v3066_v27, %v4258_v54 }
 0x183   : > { %v1386_v43 = vpop.f32.mrf.mxu1  ;;  %v3103_v9 = vpop.f32.mrf.mxu0 }
 0x184   : > { %4750 = vst [vmem:[#allocation12_spill] sm:$0xff] %v4352_v56  ;;  %v4355_v50 = vadd.f32 %v3100_v24, %v1441_v48  ;;  %v1439_v10 = vadd.f32 %v1386_v43, %v4262_v23 }
 0x185   : > { %v3069_v4 = vpop.f32.mrf.mxu1  ;;  %v1609_v21 = vpop.f32.mrf.mxu0 }
 0x186   : > { %4751 = vst [vmem:[#allocation13_spill] sm:$0xff] %v4355_v50  ;;  %v4358_v0 = vadd.f32 %v1596_v15, %v1439_v10  ;;  %v1444_v31 = vadd.f32 %v3069_v4, %v4265_v11 }
 0x187   : > { %v1399_v32 = vpop.f32.mrf.mxu1  ;;  %v3104_v53 = vpop.f32.mrf.mxu0 }
 0x188   : > { %4752 = vst [vmem:[#allocation14_spill] sm:$0xff] %v4358_v0  ;;  %v4361_v49 = vadd.f32 %v3103_v9, %v1444_v31  ;;  %v1442_v41 = vadd.f32 %v1399_v32, %v4268_v55 }
 0x189   : > { %v3070_v3 = vpop.f32.mrf.mxu1  ;;  %v1612_v54 = vpop.f32.mrf.mxu0 }
 0x18a   : > { %4753 = vst [vmem:[#allocation15_spill] sm:$0xff] %v4361_v49  ;;  %v4364_v33 = vadd.f32 %v1609_v21, %v1442_v41  ;;  %v1445_v5 = vadd.f32 %v3070_v3, %v4271_v57 }
 0x18b   : > { %v1402_v7 = vpop.f32.mrf.mxu1  ;;  %v4367_v23 = vpop.f32.mrf.mxu0 }
 0x18c   : > { %4754 = vst [vmem:[#allocation16_spill] sm:$0xff] %v4364_v33  ;;  %v4369_v26 = vadd.f32 %v3104_v53, %v1445_v5  ;;  %v1443_v51 = vadd.f32 %v1402_v7, %v4274_v42 }
 0x18d   : > { %v3109_v11 = vpop.f32.mrf.mxu1  ;;  %v4372_v36 = vpop.f32.mrf.mxu0 }
 0x18e   : > { %4755 = vst [vmem:[#allocation17_spill] sm:$0xff] %v4369_v26  ;;  %v4374_v22 = vadd.f32 %v1612_v54, %v1443_v51 }
 0x18f   : > { %v1701_v1 = vpop.f32.mrf.mxu1  ;;  %v4376_v55 = vpop.f32.mrf.mxu0 }
 0x190   : > { %4756 = vst [vmem:[#allocation18_spill] sm:$0xff] %v4374_v22 }
 0x191   : > { %v4378_v20 = vpop.f32.mrf.mxu1  ;;  %v4380_v59 = vpop.f32.mrf.mxu0 }
 0x193   : > { %v4382_v57 = vpop.f32.mrf.mxu1  ;;  %v4384_v14 = vpop.f32.mrf.mxu0 }
 0x195   : > { %v4386_v6 = vpop.f32.mrf.mxu1  ;;  %v4388_v46 = vpop.f32.mrf.mxu0 }
 0x197   : > { %v4390_v42 = vpop.f32.mrf.mxu1  ;;  %v4392_v30 = vpop.f32.mrf.mxu0 }
 0x199   : > { %v4394_v24 = vpop.f32.mrf.mxu1  ;;  %v4396_v25 = vpop.f32.mrf.mxu0 }
 0x19b   : > { %v4398_v27 = vpop.f32.mrf.mxu1  ;;  %v4400_v15 = vpop.f32.mrf.mxu0 }
 0x19d   : > { %v4402_v48 = vpop.f32.mrf.mxu1  ;;  %v4404_v43 = vpop.f32.mrf.mxu0 }
 0x19f   : > { %v4406_v9 = vpop.f32.mrf.mxu1  ;;  %v4408_v10 = vpop.f32.mrf.mxu0 }
 0x1a1   : > { %v4410_v4 = vpop.f32.mrf.mxu1  ;;  %v4412_v21 = vpop.f32.mrf.mxu0 }
 0x1a3   : > { %v4414_v31 = vpop.f32.mrf.mxu1  ;;  %v4416_v32 = vpop.f32.mrf.mxu0 }
 0x1a5   : > { %v4418_v53 = vpop.f32.mrf.mxu1  ;;  %v4420_v41 = vpop.f32.mrf.mxu0 }
 0x1a7   : > { %v4422_v3 = vpop.f32.mrf.mxu1  ;;  %v4424_v54 = vpop.f32.mrf.mxu0 }
 0x1a9   : > { %v4426_v5 = vpop.f32.mrf.mxu1  ;;  %v4428_v7 = vpop.f32.mrf.mxu0 }
 0x1ab   : > { %v4430_v51 = vpop.f32.mrf.mxu1  ;;  %v4432_v22 = vpop.f32.mrf.mxu0 }
 0x1ad   : > { %v4434_v26 = vpop.f32.mrf.mxu1  ;;  %v4436_v33 = vpop.f32.mrf.mxu0 }
 0x1ae   : > { %4757 = vst [vmem:[#allocation19_spill] sm:$0xff] %v4436_v33 }
 0x1af   : > { %v4438_v49 = vpop.f32.mrf.mxu1  ;;  %v4440_v0 = vpop.f32.mrf.mxu0 }
 0x1b0   : > { %4758 = vst [vmem:[#allocation20_spill] sm:$0xff] %v4440_v0 }
 0x1b1   : > { %v4442_v50 = vpop.f32.mrf.mxu1  ;;  %v4444_v56 = vpop.f32.mrf.mxu0 }
 0x1b2   : > { %4759 = vst [vmem:[#allocation21_spill] sm:$0xff] %v4442_v50  ;;  %4760 = vst [vmem:[#allocation22_spill] sm:$0xff] %v4444_v56 }
 0x1b3   : > { %v4446_v35 = vpop.f32.mrf.mxu1  ;;  %v4448_v13 = vpop.f32.mrf.mxu0 }
 0x1b4   : > { %4761 = vst [vmem:[#allocation23_spill] sm:$0xff] %v4446_v35  ;;  %4762 = vst [vmem:[#allocation24_spill] sm:$0xff] %v4448_v13 }
 0x1b5   : > { %v4450_v34 = vpop.f32.mrf.mxu1  ;;  %v4452_v19 = vpop.f32.mrf.mxu0 }
 0x1b6   : > { %4763 = vst [vmem:[#allocation25_spill] sm:$0xff] %v4450_v34  ;;  %4764 = vst [vmem:[#allocation26_spill] sm:$0xff] %v4452_v19 }
 0x1b7   : > { %v4454_v63 = vpop.f32.mrf.mxu1  ;;  %v4456_v61 = vpop.f32.mrf.mxu0 }
 0x1b8   : > { %4765 = vst [vmem:[#allocation27_spill] sm:$0xff] %v4454_v63  ;;  %4766 = vst [vmem:[#allocation28_spill] sm:$0xff] %v4456_v61 }
 0x1b9   : > { %v4458_v33 = vpop.f32.mrf.mxu1  ;;  %v4460_v52 = vpop.f32.mrf.mxu0 }
 0x1ba   : > { %4767 = vst [vmem:[#allocation29_spill] sm:$0xff] %v4458_v33  ;;  %4768 = vst [vmem:[#allocation30_spill] sm:$0xff] %v4460_v52 }
 0x1bb   : > { %v4462_v0 = vpop.f32.mrf.mxu1  ;;  %v4464_v50 = vpop.f32.mrf.mxu0 }
 0x1bc   : > { %4769 = vst [vmem:[#allocation31_spill] sm:$0xff] %v4462_v0  ;;  %4770 = vst [vmem:[#allocation32_spill] sm:$0xff] %v4464_v50 }
 0x1bd   : > { %v4466_v56 = vpop.f32.mrf.mxu1  ;;  %v4468_v13 = vpop.f32.mrf.mxu0 }
 0x1be   : > { %4771 = vst [vmem:[#allocation33_spill] sm:$0xff] %v4466_v56  ;;  %4772 = vst [vmem:[#allocation34_spill] sm:$0xff] %v4468_v13 }
 0x1bf   : > { %v4470_v34 = vpop.f32.mrf.mxu1  ;;  %v4472_v19 = vpop.f32.mrf.mxu0 }
 0x1c0   : > { %4773 = vst [vmem:[#allocation35_spill] sm:$0xff] %v4470_v34  ;;  %4774 = vst [vmem:[#allocation36_spill] sm:$0xff] %v4472_v19  ;;  %v1830_v34 = vadd.f32 %v3109_v11, %v4277_v29  ;;  %v1829_v11 = vadd.f32 %v4382_v57, %v4286_v16 }
 0x1c1   : > { %v4474_v63 = vpop.f32.mrf.mxu1  ;;  %v4476_v61 = vpop.f32.mrf.mxu0 }
 0x1c2   : > { %4775 = vst [vmem:[#allocation37_spill] sm:$0xff] %v4474_v63  ;;  %4776 = vst [vmem:[#allocation38_spill] sm:$0xff] %v4476_v61  ;;  %v1828_v61 = vadd.f32 %v1701_v1, %v4280_v37  ;;  %v2028_v35 = vadd.f32 %v4380_v59, %v1829_v11 }
 0x1c3   : > { %v4478_v33 = vpop.f32.mrf.mxu1  ;;  %v4480_v52 = vpop.f32.mrf.mxu0 }
 0x1c4   : > { %4777 = vst [vmem:[#allocation39_spill] sm:$0xff] %v4478_v33  ;;  %4778 = vst [vmem:[#allocation40_spill] sm:$0xff] %v4480_v52  ;;  %v2027_v29 = vadd.f32 %v4372_v36, %v1828_v61  ;;  %v1832_v61 = vadd.f32 %v4390_v42, %v4292_v2 }
 0x1c5   : > { %v4482_v0 = vpop.f32.mrf.mxu1  ;;  %v4484_v50 = vpop.f32.mrf.mxu0 }
 0x1c6   : > { %4779 = vst [vmem:[#allocation41_spill] sm:$0xff] %v4482_v0  ;;  %4780 = vst [vmem:[#allocation42_spill] sm:$0xff] %v4484_v50  ;;  %v2029_v0 = vadd.f32 %v4367_v23, %v1830_v34  ;;  %v1831_v50 = vadd.f32 %v4378_v20, %v4283_v17  ;;  %v1834_v34 = vadd.f32 %v4386_v6, %v4289_v39 }
 0x1c7   : > { %v4486_v56 = vpop.f32.mrf.mxu1  ;;  %v4488_v13 = vpop.f32.mrf.mxu0  ;;  %v2031_v59 = vadd.f32 %v4388_v46, %v1832_v61 }
 0x1c8   : > { %4781 = vst [vmem:[#allocation43_spill] sm:$0xff] %v4486_v56  ;;  %4782 = vst [vmem:[#allocation44_spill] sm:$0xff] %v4488_v13 }
 0x1c9   : > { %v4491_v19 = vpop.f32.mrf.mxu1  ;;  %v4493_v63 = vpop.f32.mrf.mxu0 }
 0x1ca   : > { %4783 = vst [vmem:[#allocation45_spill] sm:$0xff] %v4491_v19  ;;  %4784 = vst [vmem:[#allocation46_spill] sm:$0xff] %v4493_v63 }
 0x1cb   : > { %v4497_v33 = vpop.f32.mrf.mxu1  ;;  %v3211_v52 = vpop.f32.mrf.mxu0 }
 0x1cc   : > { %4785 = vst [vmem:[#allocation47_spill] sm:$0xff] %v4497_v33  ;;  %v2030_v33 = vadd.f32 %v4376_v55, %v1831_v50 }
 0x1cd   : > { %v3177_v13 = vpop.f32.mrf.mxu1  ;;  %v2314_v56 = vpop.f32.mrf.mxu0 }
 0x1ce   : > { %v2239_v63 = vadd.f32 %v3177_v13, %v2029_v0 }
 0x1cf   : > { %v2110_v37 = vpop.f32.mrf.mxu1  ;;  %v3212_v1 = vpop.f32.mrf.mxu0 }
 0x1d0   : > { %v2443_v23 = vadd.f32 %v3211_v52, %v2239_v63  ;;  %v2237_v17 = vadd.f32 %v2110_v37, %v2027_v29  ;;  %v2033_v52 = vadd.f32 %v4384_v14, %v1834_v34  ;;  %v1835_v63 = vadd.f32 %v4394_v24, %v4295_v8 }
 0x1d1   : > { %v3178_v20 = vpop.f32.mrf.mxu1  ;;  %v2317_v19 = vpop.f32.mrf.mxu0 }
 0x1d2   : > { %2476 = vst.msk [vmem:[%s4513_s30 + $0x10] sm:$0xff] %vm2473_vm5, %v2443_v23  ;;  %v2441_v16 = vadd.f32 %v2314_v56, %v2237_v17  ;;  %v2240_v13 = vadd.f32 %v3178_v20, %v2030_v33  ;;  %v1833_v56 = vadd.f32 %v4398_v27, %v4298_v12  ;;  %v2034_v8 = vadd.f32 %v4392_v30, %v1835_v63 }
 0x1d3   : > { %v2113_v50 = vpop.f32.mrf.mxu1  ;;  %v3215_v39 = vpop.f32.mrf.mxu0 }
 0x1d4   : > { %2474 = vst.msk [vmem:[%s4513_s30] sm:$0xff] %vm2473_vm5, %v2441_v16  ;;  %v2444_v2 = vadd.f32 %v3212_v1, %v2240_v13  ;;  %v2238_v0 = vadd.f32 %v2113_v50, %v2028_v35  ;;  %v1838_v35 = vadd.f32 %v4402_v48, %v4301_v38  ;;  %v2032_v12 = vadd.f32 %v4396_v25, %v1833_v56 }
 0x1d5   : > { %v3181_v36 = vpop.f32.mrf.mxu1  ;;  %v2330_v55 = vpop.f32.mrf.mxu0  ;;  %v1839_v48 = vadd.f32 %v4410_v4, %v4307_v60  ;;  %v1842_v4 = vadd.f32 %v4418_v53, %v4313_v44  ;;  %v1843_v53 = vadd.f32 %v4426_v5, %v4319_v62  ;;  %v1846_v5 = vadd.f32 %v4434_v26, %v4325_v18  ;;  %v4786_v26 = vld [vmem:[#allocation6_spill] sm:$0xff] }
 0x1d6   : > { %2477 = vst.msk [vmem:[%s4513_s30 + $0x18] sm:$0xff] %vm2473_vm5, %v2444_v2  ;;  %v2442_v33 = vadd.f32 %v2317_v19, %v2238_v0  ;;  %v2243_v57 = vadd.f32 %v3181_v36, %v2033_v52  ;;  %v1836_v19 = vadd.f32 %v4406_v9, %v4304_v28  ;;  %v2037_v38 = vadd.f32 %v4400_v15, %v1838_v35 }
 0x1d7   : > { %v2126_v14 = vpop.f32.mrf.mxu1  ;;  %v3216_v6 = vpop.f32.mrf.mxu0  ;;  %v1837_v9 = vadd.f32 %v4414_v31, %v4310_v45  ;;  %v2038_v60 = vadd.f32 %v4408_v10, %v1839_v48  ;;  %v1840_v31 = vadd.f32 %v4422_v3, %v4316_v58  ;;  %v2041_v44 = vadd.f32 %v4416_v32, %v1842_v4  ;;  %v4791_v48 = vld [vmem:[#allocation20_spill] sm:$0xff]  ;;  %v4796_v4 = vld [vmem:[#allocation27_spill] sm:$0xff] }
 0x1d8   : > { %2475 = vst.msk [vmem:[%s4513_s30 + $0x8] sm:$0xff] %vm2473_vm5, %v2442_v33  ;;  %v2447_v42 = vadd.f32 %v3215_v39, %v2243_v57  ;;  %v2241_v46 = vadd.f32 %v2126_v14, %v2031_v59  ;;  %v2035_v28 = vadd.f32 %v4404_v43, %v1836_v19  ;;  %v1841_v3 = vadd.f32 %v4430_v51, %v4322_v40  ;;  %v4788_v19 = vld [vmem:[#allocation19_spill] sm:$0xff] }
 0x1d9   : > { %v3182_v24 = vpop.f32.mrf.mxu1  ;;  %v2333_v29 = vpop.f32.mrf.mxu0  ;;  %v2036_v45 = vadd.f32 %v4412_v21, %v1837_v9  ;;  %v2039_v58 = vadd.f32 %v4420_v41, %v1840_v31  ;;  %v2042_v62 = vadd.f32 %v4424_v54, %v1843_v53  ;;  %v1844_v51 = vadd.f32 %v4438_v49, %v4328_v47  ;;  %v4789_v49 = vld [vmem:[#allocation5_spill] sm:$0xff]  ;;  %v4797_v31 = vld [vmem:[#allocation24_spill] sm:$0xff] }
 0x1da   : > { %2480 = vst.msk [vmem:[%s4513_s30 + $0x30] sm:$0xff] %vm2473_vm5, %v2447_v42  ;;  %v2445_v27 = vadd.f32 %v2330_v55, %v2241_v46  ;;  %v2244_v30 = vadd.f32 %v3182_v24, %v2034_v8  ;;  %v2040_v40 = vadd.f32 %v4428_v7, %v1841_v3  ;;  %v2045_v18 = vadd.f32 %v4432_v22, %v1846_v5  ;;  %v4787_v42 = vld [vmem:[#allocation21_spill] sm:$0xff]  ;;  %v4802_v3 = vld [vmem:[#allocation31_spill] sm:$0xff]  ;;  %v4803_v5 = vld [vmem:[#allocation28_spill] sm:$0xff] }
 0x1db   : > { %v2129_v11 = vpop.f32.mrf.mxu1  ;;  %v3219_v37 = vpop.f32.mrf.mxu0  ;;  %v1847_v46 = vadd.f32 %v4787_v42, %v4786_v26  ;;  %v2043_v47 = vadd.f32 %v4788_v19, %v1844_v51  ;;  %v4808_v26 = vld [vmem:[#allocation35_spill] sm:$0xff] }
 0x1dc   : > { %2478 = vst.msk [vmem:[%s4513_s30 + $0x20] sm:$0xff] %vm2473_vm5, %v2445_v27  ;;  %v2448_v1 = vadd.f32 %v3216_v6, %v2244_v30  ;;  %v2242_v25 = vadd.f32 %v2129_v11, %v2032_v12  ;;  %v4790_v27 = vld [vmem:[#allocation23_spill] sm:$0xff] }
 0x1dd   : > { %v3185_v34 = vpop.f32.mrf.mxu1  ;;  %v2346_v23 = vpop.f32.mrf.mxu0  ;;  %v1845_v30 = vadd.f32 %v4790_v27, %v4789_v49  ;;  %v4811_v49 = vld [vmem:[#allocation37_spill] sm:$0xff] }
 0x1de   : > { %2481 = vst.msk [vmem:[%s4513_s30 + $0x38] sm:$0xff] %vm2473_vm5, %v2448_v1  ;;  %v2446_v17 = vadd.f32 %v2333_v29, %v2242_v25  ;;  %v2247_v15 = vadd.f32 %v3185_v34, %v2037_v38  ;;  %v2046_v1 = vadd.f32 %v4791_v48, %v1847_v46  ;;  %v4792_v25 = vld [vmem:[#allocation7_spill] sm:$0xff]  ;;  %v4793_v34 = vld [vmem:[#allocation25_spill] sm:$0xff] }
 0x1df   : > { %v2142_v20 = vpop.f32.mrf.mxu1  ;;  %v3220_v61 = vpop.f32.mrf.mxu0 }
 0x1e0   : > { %2479 = vst.msk [vmem:[%s4513_s30 + $0x28] sm:$0xff] %vm2473_vm5, %v2446_v17  ;;  %v2451_v16 = vadd.f32 %v3219_v37, %v2247_v15  ;;  %v2245_v43 = vadd.f32 %v2142_v20, %v2035_v28  ;;  %v4794_v20 = vld [vmem:[#allocation22_spill] sm:$0xff] }
 0x1e1   : > { %v3186_v13 = vpop.f32.mrf.mxu1  ;;  %v2349_v50 = vpop.f32.mrf.mxu0 }
 0x1e2   : > { %2484 = vst.msk [vmem:[%s4513_s30 + $0x50] sm:$0xff] %vm2473_vm5, %v2451_v16  ;;  %v2449_v39 = vadd.f32 %v2346_v23, %v2245_v43  ;;  %v2248_v10 = vadd.f32 %v3186_v13, %v2038_v60  ;;  %v1850_v23 = vadd.f32 %v4793_v34, %v4792_v25  ;;  %v4795_v60 = vld [vmem:[#allocation8_spill] sm:$0xff]  ;;  %v4814_v25 = vld [vmem:[#allocation39_spill] sm:$0xff] }
 0x1e3   : > { %v2145_v52 = vpop.f32.mrf.mxu1  ;;  %v3223_v63 = vpop.f32.mrf.mxu0  ;;  %v1848_v16 = vadd.f32 %v4796_v4, %v4795_v60  ;;  %v4817_v60 = vld [vmem:[#allocation41_spill] sm:$0xff] }
 0x1e4   : > { %2482 = vst.msk [vmem:[%s4513_s30 + $0x40] sm:$0xff] %vm2473_vm5, %v2449_v39  ;;  %v2452_v2 = vadd.f32 %v3220_v61, %v2248_v10  ;;  %v2246_v21 = vadd.f32 %v2145_v52, %v2036_v45  ;;  %v2044_v61 = vadd.f32 %v4794_v20, %v1845_v30  ;;  %v2049_v39 = vadd.f32 %v4797_v31, %v1850_v23  ;;  %v4798_v10 = vld [vmem:[#allocation9_spill] sm:$0xff] }
 0x1e5   : > { %v3189_v0 = vpop.f32.mrf.mxu1  ;;  %v2362_v36 = vpop.f32.mrf.mxu0  ;;  %v4799_v52 = vld [vmem:[#allocation29_spill] sm:$0xff] }
 0x1e6   : > { %2485 = vst.msk [vmem:[%s4513_s30 + $0x58] sm:$0xff] %vm2473_vm5, %v2452_v2  ;;  %v2450_v55 = vadd.f32 %v2349_v50, %v2246_v21  ;;  %v2251_v32 = vadd.f32 %v3189_v0, %v2041_v44  ;;  %v4800_v0 = vld [vmem:[#allocation26_spill] sm:$0xff] }
 0x1e7   : > { %v2158_v59 = vpop.f32.mrf.mxu1  ;;  %v3224_v56 = vpop.f32.mrf.mxu0 }
 0x1e8   : > { %2483 = vst.msk [vmem:[%s4513_s30 + $0x48] sm:$0xff] %vm2473_vm5, %v2450_v55  ;;  %v2455_v33 = vadd.f32 %v3223_v63, %v2251_v32  ;;  %v2249_v41 = vadd.f32 %v2158_v59, %v2039_v58  ;;  %v1851_v63 = vadd.f32 %v4799_v52, %v4798_v10  ;;  %v4801_v58 = vld [vmem:[#allocation10_spill] sm:$0xff]  ;;  %v4820_v10 = vld [vmem:[#allocation43_spill] sm:$0xff] }
 0x1e9   : > { %v3190_v57 = vpop.f32.mrf.mxu1  ;;  %v2365_v14 = vpop.f32.mrf.mxu0  ;;  %v1849_v55 = vadd.f32 %v4802_v3, %v4801_v58  ;;  %v4823_v58 = vld [vmem:[#allocation45_spill] sm:$0xff] }
 0x1ea   : > { %2488 = vst.msk [vmem:[%s4513_s30 + $0x70] sm:$0xff] %vm2473_vm5, %v2455_v33  ;;  %v2453_v6 = vadd.f32 %v2362_v36, %v2249_v41  ;;  %v2252_v54 = vadd.f32 %v3190_v57, %v2042_v62  ;;  %v2047_v36 = vadd.f32 %v4800_v0, %v1848_v16  ;;  %v2050_v33 = vadd.f32 %v4803_v5, %v1851_v63  ;;  %v4804_v41 = vld [vmem:[#allocation11_spill] sm:$0xff]  ;;  %v4805_v57 = vld [vmem:[#allocation33_spill] sm:$0xff] }
 0x1eb   : > { %v2161_v8 = vpop.f32.mrf.mxu1  ;;  %v3227_v35 = vpop.f32.mrf.mxu0 }
 0x1ec   : > { %2486 = vst.msk [vmem:[%s4513_s30 + $0x60] sm:$0xff] %vm2473_vm5, %v2453_v6  ;;  %v2456_v24 = vadd.f32 %v3224_v56, %v2252_v54  ;;  %v2250_v7 = vadd.f32 %v2161_v8, %v2040_v40  ;;  %v4806_v8 = vld [vmem:[#allocation30_spill] sm:$0xff] }
 0x1ed   : > { %v3193_v29 = vpop.f32.mrf.mxu1  ;;  %v2378_v12 = vpop.f32.mrf.mxu0 }
 0x1ee   : > { %2489 = vst.msk [vmem:[%s4513_s30 + $0x78] sm:$0xff] %vm2473_vm5, %v2456_v24  ;;  %v2454_v11 = vadd.f32 %v2365_v14, %v2250_v7  ;;  %v2255_v22 = vadd.f32 %v3193_v29, %v2045_v18  ;;  %v1854_v14 = vadd.f32 %v4805_v57, %v4804_v41  ;;  %v4807_v18 = vld [vmem:[#allocation12_spill] sm:$0xff]  ;;  %v4826_v41 = vld [vmem:[#allocation47_spill] sm:$0xff] }
 0x1ef   : > { %v2174_v37 = vpop.f32.mrf.mxu1  ;;  %v3228_v38 = vpop.f32.mrf.mxu0  ;;  %v1852_v42 = vadd.f32 %v4808_v26, %v4807_v18 }
 0x1f0   : > { %2487 = vst.msk [vmem:[%s4513_s30 + $0x68] sm:$0xff] %vm2473_vm5, %v2454_v11  ;;  %v2459_v28 = vadd.f32 %v3227_v35, %v2255_v22  ;;  %v2253_v9 = vadd.f32 %v2174_v37, %v2043_v47  ;;  %v2048_v35 = vadd.f32 %v4806_v8, %v1849_v55  ;;  %v4810_v47 = vld [vmem:[#allocation13_spill] sm:$0xff] }
 0x1f1   : > { %v3194_v17 = vpop.f32.mrf.mxu1  ;;  %v2381_v15 = vpop.f32.mrf.mxu0  ;;  %v1855_v27 = vadd.f32 %v4811_v49, %v4810_v47 }
 0x1f2   : > { %2492 = vst.msk [vmem:[%s4513_s30 + $0x90] sm:$0xff] %vm2473_vm5, %v2459_v28  ;;  %v2457_v43 = vadd.f32 %v2378_v12, %v2253_v9  ;;  %v2256_v13 = vadd.f32 %v3194_v17, %v2046_v1  ;;  %v4809_v12 = vld [vmem:[#allocation32_spill] sm:$0xff]  ;;  %v4813_v1 = vld [vmem:[#allocation14_spill] sm:$0xff] }
 0x1f3   : > { %v2177_v50 = vpop.f32.mrf.mxu1  ;;  %v3231_v45 = vpop.f32.mrf.mxu0  ;;  %v2053_v19 = vadd.f32 %v4809_v12, %v1854_v14  ;;  %v1853_v34 = vadd.f32 %v4814_v25, %v4813_v1 }
 0x1f4   : > { %2490 = vst.msk [vmem:[%s4513_s30 + $0x80] sm:$0xff] %vm2473_vm5, %v2457_v43  ;;  %v2460_v44 = vadd.f32 %v3228_v38, %v2256_v13  ;;  %v2254_v53 = vadd.f32 %v2177_v50, %v2044_v61  ;;  %v4812_v38 = vld [vmem:[#allocation34_spill] sm:$0xff]  ;;  %v4816_v61 = vld [vmem:[#allocation15_spill] sm:$0xff] }
 0x1f5   : > { %v3197_v2 = vpop.f32.mrf.mxu1  ;;  %v2394_v21 = vpop.f32.mrf.mxu0  ;;  %v2051_v48 = vadd.f32 %v4812_v38, %v1852_v42  ;;  %v1858_v4 = vadd.f32 %v4817_v60, %v4816_v61  ;;  %v4828_v42 = vld [vmem:[#allocation46_spill] sm:$0xff] }
 0x1f6   : > { %2493 = vst.msk [vmem:[%s4513_s30 + $0x98] sm:$0xff] %vm2473_vm5, %v2460_v44  ;;  %v2458_v32 = vadd.f32 %v2381_v15, %v2254_v53  ;;  %v2259_v59 = vadd.f32 %v3197_v2, %v2049_v39  ;;  %v4815_v15 = vld [vmem:[#allocation36_spill] sm:$0xff] }
 0x1f7   : > { %v2190_v56 = vpop.f32.mrf.mxu1  ;;  %v3232_v62 = vpop.f32.mrf.mxu0  ;;  %v2054_v20 = vadd.f32 %v4815_v15, %v1855_v27  ;;  %v4819_v39 = vld [vmem:[#allocation16_spill] sm:$0xff] }
 0x1f8   : > { %2491 = vst.msk [vmem:[%s4513_s30 + $0x88] sm:$0xff] %vm2473_vm5, %v2458_v32  ;;  %v2463_v40 = vadd.f32 %v3231_v45, %v2259_v59  ;;  %v2257_v51 = vadd.f32 %v2190_v56, %v2047_v36  ;;  %v4818_v45 = vld [vmem:[#allocation38_spill] sm:$0xff]  ;;  %v1856_v52 = vadd.f32 %v4820_v10, %v4819_v39  ;;  %v4822_v36 = vld [vmem:[#allocation17_spill] sm:$0xff] }
 0x1f9   : > { %v3198_v6 = vpop.f32.mrf.mxu1  ;;  %v2397_v54 = vpop.f32.mrf.mxu0  ;;  %v2052_v31 = vadd.f32 %v4818_v45, %v1853_v34  ;;  %v1859_v3 = vadd.f32 %v4823_v58, %v4822_v36 }
 0x1fa   : > { %2496 = vst.msk [vmem:[%s4513_s30 + $0xb0] sm:$0xff] %vm2473_vm5, %v2463_v40  ;;  %v2461_v46 = vadd.f32 %v2394_v21, %v2257_v51  ;;  %v2260_v24 = vadd.f32 %v3198_v6, %v2050_v33  ;;  %v4821_v21 = vld [vmem:[#allocation40_spill] sm:$0xff]  ;;  %v4825_v33 = vld [vmem:[#allocation18_spill] sm:$0xff] }
 0x1fb   : > { %v2193_v7 = vpop.f32.mrf.mxu1  ;;  %v3235_v29 = vpop.f32.mrf.mxu0  ;;  %v2057_v0 = vadd.f32 %v4821_v21, %v1858_v4  ;;  %v1857_v57 = vadd.f32 %v4826_v41, %v4825_v33  ;;  %v4827_v6 = vld [vmem:[#allocation44_spill] sm:$0xff] }
 0x1fc   : > { %2494 = vst.msk [vmem:[%s4513_s30 + $0xa0] sm:$0xff] %vm2473_vm5, %v2461_v46  ;;  %v2464_v30 = vadd.f32 %v3232_v62, %v2260_v24  ;;  %v2258_v11 = vadd.f32 %v2193_v7, %v2048_v35  ;;  %v4824_v62 = vld [vmem:[#allocation42_spill] sm:$0xff] }
 0x1fd   : > { %v3201_v22 = vpop.f32.mrf.mxu1  ;;  %v2410_v37 = vpop.f32.mrf.mxu0  ;;  %v2055_v5 = vadd.f32 %v4824_v62, %v1856_v52  ;;  %v2056_v46 = vadd.f32 %v4828_v42, %v1857_v57 }
 0x1fe   : > { %2497 = vst.msk [vmem:[%s4513_s30 + $0xb8] sm:$0xff] %vm2473_vm5, %v2464_v30  ;;  %v2462_v23 = vadd.f32 %v2397_v54, %v2258_v11  ;;  %v2263_v28 = vadd.f32 %v3201_v22, %v2053_v19  ;;  %v2058_v54 = vadd.f32 %v4827_v6, %v1859_v3 }
 0x1ff   : > { %v2206_v9 = vpop.f32.mrf.mxu1  ;;  %v3236_v17 = vpop.f32.mrf.mxu0 }
 0x200   : > { %2495 = vst.msk [vmem:[%s4513_s30 + $0xa8] sm:$0xff] %vm2473_vm5, %v2462_v23  ;;  %v2467_v16 = vadd.f32 %v3235_v29, %v2263_v28  ;;  %v2261_v43 = vadd.f32 %v2206_v9, %v2051_v48 }
 0x201   : > { %v3202_v13 = vpop.f32.mrf.mxu1  ;;  %v2413_v50 = vpop.f32.mrf.mxu0 }
 0x202   : > { %2500 = vst.msk [vmem:[%s4513_s30 + $0xd0] sm:$0xff] %vm2473_vm5, %v2467_v16  ;;  %v2465_v63 = vadd.f32 %v2410_v37, %v2261_v43  ;;  %v2264_v44 = vadd.f32 %v3202_v13, %v2054_v20 }
 0x203   : > { %v2209_v53 = vpop.f32.mrf.mxu1  ;;  %v3239_v2 = vpop.f32.mrf.mxu0 }
 0x204   : > { %2498 = vst.msk [vmem:[%s4513_s30 + $0xc0] sm:$0xff] %vm2473_vm5, %v2465_v63  ;;  %v2468_v55 = vadd.f32 %v3236_v17, %v2264_v44  ;;  %v2262_v32 = vadd.f32 %v2209_v53, %v2052_v31 }
 0x205   : > { %v3205_v59 = vpop.f32.mrf.mxu1  ;;  %v2426_v56 = vpop.f32.mrf.mxu0 }
 0x206   : > { %2501 = vst.msk [vmem:[%s4513_s30 + $0xd8] sm:$0xff] %vm2473_vm5, %v2468_v55  ;;  %v2466_v14 = vadd.f32 %v2413_v50, %v2262_v32  ;;  %v2267_v40 = vadd.f32 %v3205_v59, %v2057_v0 }
 0x207   : > { %v2222_v51 = vpop.f32.mrf.mxu1  ;;  %v3240_v26 = vpop.f32.mrf.mxu0 }
 0x208   : > { %2499 = vst.msk [vmem:[%s4513_s30 + $0xc8] sm:$0xff] %vm2473_vm5, %v2466_v14  ;;  %v2471_v8 = vadd.f32 %v3239_v2, %v2267_v40  ;;  %v2265_v35 = vadd.f32 %v2222_v51, %v2055_v5 }
 0x209   : > { %v3206_v18 = vpop.f32.mrf.mxu1  ;;  %v2429_v47 = vpop.f32.mrf.mxu0 }
 0x20a   : > { %2504 = vst.msk [vmem:[%s4513_s30 + $0xf0] sm:$0xff] %vm2473_vm5, %v2471_v8  ;;  %v2469_v24 = vadd.f32 %v2426_v56, %v2265_v35  ;;  %v2268_v7 = vadd.f32 %v3206_v18, %v2058_v54 }
 0x20b   : > { %v2225_v29 = vpop.f32.mrf.mxu1 }
 0x20c   : > { %2502 = vst.msk [vmem:[%s4513_s30 + $0xe0] sm:$0xff] %vm2473_vm5, %v2469_v24  ;;  %v2472_v12 = vadd.f32 %v3240_v26, %v2268_v7  ;;  %v2266_v19 = vadd.f32 %v2225_v29, %v2056_v46 }
 0x20e   : > { %2505 = vst.msk [vmem:[%s4513_s30 + $0xf8] sm:$0xff] %vm2473_vm5, %v2472_v12  ;;  %v2470_v49 = vadd.f32 %v2429_v47, %v2266_v19 }
 0x210   : > { %2503 = vst.msk [vmem:[%s4513_s30 + $0xe8] sm:$0xff] %vm2473_vm5, %v2470_v49 }
 0x211   : > { %3315 = shalt.err (!%p3312_p5)
}
 0x212   : > { %s3316_s20 = scalar_lea.hbm %s4660_s7, 4096  ;;  %s3320_s25 = scalar_lea.hbm %s4717_s2, 8192 }
 0x213   : > { %p3317_p6 = scmp.ne.s32.totalorder %s4660_s7, %s3316_s20  ;;  %p3321_p10 = scmp.lt.s32.totalorder %s4660_s7, %s4717_s2 }
 0x214   : > { %p3322_p11 = scmp.lt.s32.totalorder %s3320_s25, %s3316_s20 }
 0x215   : > { %p3318_p7 = pnand %p3317_p6, %p3439_p4 }
 0x216   : > { %p3323_p12 = por %p3322_p11, %p3321_p10 }
 0x217   : > { %p3319_p9 = pneg %p3318_p7 }
 0x219   : > { %p3324_p13 = pnand %p3323_p12, %p3319_p9 }
 0x21b   : > { %3327 = shalt.err (!%p3324_p13)
}
 0x21c   : > { %s3382_s28 = smov 128   ;;  %s3383_s29 = smov 8  }
 0x21d   : > { %3244 = dma.vmem_to_hbm [thread:$0]  (%p3439_p4), %s4662_s4, 4096, %s4660_s7, %s4670_s12, %s3382_s28, %s3382_s28, %s3383_s29  }
 0x21e PF: > { %p3250_p0 = scmp.ge.s32.totalorder %s3378_s14, 2  ;;  %s2538_s30 = sand.u32 1, %s3358_s9  }
 0x21f   : > { %s2539_s3 = scalar_lea.sflag [#allocation3], %s2538_s30 }
 0x220   : > { %p3247_p1 = pnand %p3250_p0, %p3446_p8 }
 0x222   : > { %p3248_p2 = pneg %p3247_p1 }
 0x224   : > { %3353 = dma.done.wait (%p3248_p2), %s2539_s3, 4096  }
 0x225   : > { %3355 = vsyncadd (%p3248_p2), %s2539_s3, 4294963200  ;;  %s15_s14 = sadd.s32 1, %s3378_s14   ;;  %s4829_s9 = smov %s3362_s10 }
 0x226   : > { %p12_p3 = scmp.ge.s32.totalorder %s15_s14, 4   ;;  %s4830_s10 = smov %s3366_s11 }
 0x227   : > { %s4831_s11 = smov %s3452_s22  ;;  %s4832_s12 = smov %s3374_s13 }
 0x228   : > { %s4833_s13 = smov %s4835_s17  ;;  %14 = sbr.rel (!%p12_p3) target bundleno = 4 (0x4), region = 66 }
 0x22d   :  { %2544 = vsyncpa [#allocation3], 1 }
 0x22e   :  { %2546 = vsyncpa [#allocation3 + $0x1], 1 }

</bundles_post_ra>
